<compile_context>
chip_gen: v7x
topology: tpu7x:2x2x1
jax: 0.10.0
libtpu: 0.0.40
codegen_flags: <defaults>
</compile_context>

<pallas_src>
import functools
import random

import jax
import jax.numpy as jnp
from jax import lax
from jax.experimental import pallas as pl
from jax.experimental.pallas import tpu as pltpu


def _count_kernel(xhalf_ref, yhalf_ref, x_ref, yt_ref, cnt_ref):
    """Grid = (row blocks [parallel], y-column blocks [arbitrary/reduction]).

    cnt_ref is the resident lane-wide (tm, 128) int32 accumulator (its block
    index is constant along the reduction axis).  Per 128-lane chunk of the
    current y tile: MXU dot -> f32 threshold compare -> int32 accumulate, so
    no (tm, tn) intermediate ever hits VMEM.
    """
    k = pl.program_id(1)

    @pl.when(k == 0)
    def _():
        cnt_ref[...] = jnp.zeros_like(cnt_ref)

    x = x_ref[...]                                           # (tm, D) f32
    # Hoist the lane-broadcast of 0.5*||x||^2 out of the chunk loop
    # (JAX does not CSE broadcast_in_dim).
    xb = jnp.broadcast_to(xhalf_ref[...], cnt_ref.shape)     # (tm, 128) f32
    acc = cnt_ref[...]                                       # (tm, 128) i32

    tn = yt_ref.shape[1]
    for s in range(tn // 128):                               # static, 128-aligned slices
        yt_c = yt_ref[:, s * 128:(s + 1) * 128]              # (D, 128) f32, (K,N) layout
        yh_c = yhalf_ref[:, s * 128:(s + 1) * 128]           # (1, 128) f32
        # MXU-native (M,K)x(K,N) matmul, f32 accumulate (MXU is nearly idle at D=32).
        g = lax.dot_general(
            x, yt_c,
            dimension_numbers=(((1,), (0,)), ((), ())),
            preferred_element_type=jnp.float32)
        # ||x-y||^2 < d^2  <=>  x.y > 0.5*||x||^2 + 0.5*(||y||^2 - d^2)
        acc = acc + (g > xb + yh_c).astype(jnp.int32)
    cnt_ref[...] = acc                                        # lane-dense (tm,128) store


@functools.partial(jax.jit, static_argnames=("tm", "tn"))
def _count_padded(x_pad, y_pad, n1, d, *, tm, tn):
    """x_pad: (n0p, D) f32 (rows >= the real count are arbitrary/zero),
    y_pad: (n1p, D) f32, n1: number of valid y rows (traced scalar),
    d: distance threshold (traced scalar).  Returns int32 (n0p,) counts."""
    n0p, dim = x_pad.shape
    n1p = y_pad.shape[0]
    d = jnp.asarray(d, jnp.float32)

    xhalf = 0.5 * jnp.sum(x_pad * x_pad, axis=-1, keepdims=True)       # (n0p, 1)
    yhalf = 0.5 * (jnp.sum(y_pad * y_pad, axis=-1) - d * d)            # (n1p,)
    # Padded y columns must never be counted: push their threshold to +huge (f32).
    yhalf = jnp.where(jnp.arange(n1p) < n1, yhalf, jnp.float32(3e38))[None, :]
    yt = y_pad.T                                                        # (D, n1p), MXU (K,N)

    counts2d = pl.pallas_call(
        _count_kernel,
        out_shape=jax.ShapeDtypeStruct((n0p, 128), jnp.int32),
        grid_spec=pltpu.PrefetchScalarGridSpec(
            num_scalar_prefetch=0,
            grid=(n0p // tm, n1p // tn),                      # reduction axis last
            in_specs=[
                pl.BlockSpec((tm, 1), lambda i, k: (i, 0)),      # 0.5*||x||^2
                pl.BlockSpec((1, tn), lambda i, k: (0, k)),      # 0.5*(||y||^2 - d^2)
                pl.BlockSpec((tm, dim), lambda i, k: (i, 0)),    # x rows (f32)
                pl.BlockSpec((dim, tn), lambda i, k: (0, k)),    # y^T tile, lane-dense
            ],
            out_specs=pl.BlockSpec((tm, 128), lambda i, k: (i, 0)),
        ),
        compiler_params=pltpu.CompilerParams(
            dimension_semantics=("parallel", "arbitrary")),
    )(xhalf, yhalf, x_pad, yt)
    return jnp.sum(counts2d, axis=-1)                          # single cross-lane reduce


def _bucket(n, tile, min_blocks=1):
    """Pad n up to a power-of-two multiple of `tile` (limits distinct compile shapes)."""
    blocks = max(min_blocks, pl.cdiv(n, tile))
    return tile * int(pl.next_power_of_2(blocks))


def count_within_dist(x, y, d, *, tm=128, tn=1024):
    """x: [N0, D] f32, y: [N1, D] f32.  Returns int32 [N0]:
    counts[i] = #{ j : ||x_i - y_j||_2 < d }."""
    assert tm % 8 == 0 and tn % 128 == 0
    n0, dim = x.shape
    n1 = y.shape[0]
    # >=2 row blocks so the parallel axis feeds both v7x TensorCores; bucketed
    # power-of-two shapes keep the Pallas/jit compile cache small across classes.
    n0p = _bucket(n0, tm, min_blocks=2)
    n1p = _bucket(n1, tn)

    x_pad = jnp.zeros((n0p, dim), jnp.float32).at[:n0].set(x.astype(jnp.float32))
    y_pad = jnp.zeros((n1p, dim), jnp.float32).at[:n1].set(y.astype(jnp.float32))

    counts = _count_padded(x_pad, y_pad, n1, d, tm=tm, tn=tn)
    return counts[:n0]


class CMSamplerPallas:
    """JAX/Pallas port of GCGL.Baselines.ergnn_utils.CM_sampler."""

    def __init__(self, plus):
        self.plus = plus
        self._rng = random.Random(0)  # deterministic replacement for `random.choices`

    def forward(self, ids_per_cls_train, budget, feats, reps, d):
        if self.plus:
            return self.sampling(ids_per_cls_train, budget, reps, d)
        return self.sampling(ids_per_cls_train, budget, feats, d)

    def sampling(self, ids_per_cls_train, budget, vecs, d):
        budget_dist_compute = 1000
        # Reference quantizes the vectors to fp16 before computing distances.
        # TODO(synk): the reference re-quantizes the *distances* to fp16 when both
        # sides have >= 26 samples; thresholding here is always done in f32.
        vecs = {cls: jnp.asarray(vecs[cls]).astype(jnp.float16).astype(jnp.float32)
                for cls in vecs}
        pending = {}
        for i in ids_per_cls_train:
            other_cls_ids = [j for j in ids_per_cls_train if i != j]
            ids0 = self._rng.choices(
                ids_per_cls_train[i],
                k=min(budget_dist_compute, len(ids_per_cls_train[i])))
            vecs_0 = vecs[i][jnp.asarray(ids0, dtype=jnp.int32)]

            others = []
            for j in other_cls_ids:
                ids1 = self._rng.choices(
                    ids_per_cls_train[j],
                    k=min(budget_dist_compute, len(ids_per_cls_train[j])))
                others.append(vecs[j][jnp.asarray(ids1, dtype=jnp.int32)])
            vecs_1 = jnp.concatenate(others, axis=0)

            # Fused cdist + (dist < d) + row-count in the Pallas kernel (async).
            n_selected = count_within_dist(vecs_0, vecs_1, d)
            k = min(budget, len(ids0))
            # Ascending (stable) sort of counts, take first `budget` — matches the
            # reference's n_selected.sort()[1][:budget] (tie-break order may differ
            # from torch.sort).
            idx = jnp.argsort(n_selected)[:k]
            pending[i] = idx

        # Single host sync at the end so per-class kernel dispatches overlap.
        ids_selected = {}
        for i, idx in pending.items():
            idx_host = [int(r) for r in jax.device_get(idx)]
            ids_selected[i] = [ids_per_cls_train[i][j] for j in idx_host]
        return ids_selected


if __name__ == "__main__":
    key = jax.random.PRNGKey(0)
    k_feat, k_rep = jax.random.split(key)

    # Synthetic graph: 66 nodes, 3 classes, feature dim 32, hidden (rep) dim 32.
    n_nodes, feat_dim, hid_dim = 66, 32, 32
    feats_full = jax.random.normal(k_feat, (n_nodes, feat_dim), dtype=jnp.float32)
    reps_full = jax.random.normal(k_rep, (n_nodes, hid_dim), dtype=jnp.float32)

    ids_per_cls_train = {
        0: list(range(0, 20)),
        1: list(range(20, 50)),
        2: list(range(50, 66)),
    }
    # Each class key maps to the full (globally indexable) feature / rep matrix,
    # matching how the reference indexes vecs[cls][global_node_ids].
    feats = {c: feats_full for c in ids_per_cls_train}
    reps = {c: reps_full for c in ids_per_cls_train}

    budget = 4
    d = 8.0

    # Kernel smoke test + pure-JAX reference check (direct cdist).
    x0, y0 = feats_full[:20], feats_full[20:]
    cnt = jax.block_until_ready(count_within_dist(x0, y0, d))
    assert cnt.shape == (20,)
    diff = x0[:, None, :] - y0[None, :, :]
    ref = jnp.sum(jnp.sqrt(jnp.sum(diff * diff, axis=-1)) < d, axis=-1).astype(jnp.int32)
    # <=1 slack covers pairs sitting exactly on the d boundary (fp rounding).
    assert int(jnp.max(jnp.abs(cnt - ref))) <= 1

    sampler = CMSamplerPallas(plus=False)
    out = sampler.forward(ids_per_cls_train, budget, feats, reps, d)
    sampler_plus = CMSamplerPallas(plus=True)
    out_plus = sampler_plus.forward(ids_per_cls_train, budget, feats, reps, d)

    ok = True
    for i in ids_per_cls_train:
        for sel in (out[i], out_plus[i]):
            if len(sel) != budget or any(s not in ids_per_cls_train[i] for s in sel):
                ok = False
    if ok:
        print("KERNEL_OK")
</pallas_src>

<mosaic_0001>
module attributes {stable_mosaic.version = 11 : i64} {
  func.func @_count_kernel(%arg0: i32, %arg1: i32, %arg2: memref<128x1xf32, #tpu.memory_space<vmem>>, %arg3: memref<1x1024xf32, #tpu.memory_space<vmem>>, %arg4: memref<128x32xf32, #tpu.memory_space<vmem>>, %arg5: memref<32x1024xf32, #tpu.memory_space<vmem>>, %arg6: memref<128x128xi32, #tpu.memory_space<vmem>>) attributes {dimension_semantics = [#tpu.dimension_semantics<parallel>, #tpu.dimension_semantics<arbitrary>], iteration_bounds = array<i64: 2, 1>, scalar_prefetch = 0 : i64, scratch_operands = 0 : i64, tpu.core_type = #tpu.core_type<tc>, window_params = [{transform_indices = @transform_0, window_bounds = array<i64: 128, 1>}, {transform_indices = @transform_1, window_bounds = array<i64: 1, 1024>}, {transform_indices = @transform_2, window_bounds = array<i64: 128, 32>}, {transform_indices = @transform_3, window_bounds = array<i64: 32, 1024>}, {transform_indices = @transform_4, window_bounds = array<i64: 128, 128>}]} {
    %c0_i32 = arith.constant 0 : i32
    %0 = arith.cmpi eq, %arg1, %c0_i32 : i32
    %1 = arith.extui %0 : i1 to i32
    %c0_i32_0 = arith.constant 0 : i32
    %2 = arith.cmpi ne, %1, %c0_i32_0 : i32
    scf.if %2 {
      %c0_i32_40 = arith.constant 0 : i32
      %73 = vector.broadcast %c0_i32_40 : i32 to vector<128x128xi32>
      %c0_41 = arith.constant 0 : index
      %c0_42 = arith.constant 0 : index
      %74 = vector.load %arg6[%c0_41, %c0_42] : memref<128x128xi32, #tpu.memory_space<vmem>>, vector<128x128xi32>
      tpu.vector_store %arg6[%c0_41, %c0_42], %73 {strides = array<i32>} : memref<128x128xi32, #tpu.memory_space<vmem>>, vector<128x128xi32>,
    } else {
    }
    %c0 = arith.constant 0 : index
    %c0_1 = arith.constant 0 : index
    %3 = vector.load %arg4[%c0, %c0_1] : memref<128x32xf32, #tpu.memory_space<vmem>>, vector<128x32xf32>
    %c0_2 = arith.constant 0 : index
    %c0_3 = arith.constant 0 : index
    %4 = vector.load %arg2[%c0_2, %c0_3] : memref<128x1xf32, #tpu.memory_space<vmem>>, vector<128x1xf32>
    %5 = vector.shape_cast %4 : vector<128x1xf32> to vector<128x1xf32>
    %6 = vector.broadcast %5 : vector<128x1xf32> to vector<128x128xf32>
    %c0_4 = arith.constant 0 : index
    %c0_5 = arith.constant 0 : index
    %7 = vector.load %arg6[%c0_4, %c0_5] : memref<128x128xi32, #tpu.memory_space<vmem>>, vector<128x128xi32>
    %c0_6 = arith.constant 0 : index
    %c0_7 = arith.constant 0 : index
    %8 = vector.load %arg5[%c0_6, %c0_7] : memref<32x1024xf32, #tpu.memory_space<vmem>>, vector<32x128xf32>
    %c0_8 = arith.constant 0 : index
    %c0_9 = arith.constant 0 : index
    %9 = vector.load %arg3[%c0_8, %c0_9] : memref<1x1024xf32, #tpu.memory_space<vmem>>, vector<1x128xf32>
    %cst = arith.constant dense<0.000000e+00> : vector<128x128xf32>
    %10 = tpu.matmul %3, %8, %cst {dimension_numbers = #tpu.dot_dimension_numbers<[1], [0], [0], [1], [0, 0, 1, 1], [], []>} : vector<128x32xf32>, vector<32x128xf32>, vector<128x128xf32> -> vector<128x128xf32>
    %11 = vector.broadcast %9 : vector<1x128xf32> to vector<128x128xf32>
    %12 = arith.addf %6, %11 : vector<128x128xf32>
    %13 = arith.cmpf ogt, %10, %12 : vector<128x128xf32>
    %14 = arith.extui %13 : vector<128x128xi1> to vector<128x128xi32>
    %15 = arith.addi %7, %14 : vector<128x128xi32>
    %c0_10 = arith.constant 0 : index
    %c128 = arith.constant 128 : index
    %16 = vector.load %arg5[%c0_10, %c128] : memref<32x1024xf32, #tpu.memory_space<vmem>>, vector<32x128xf32>
    %c0_11 = arith.constant 0 : index
    %c128_12 = arith.constant 128 : index
    %17 = vector.load %arg3[%c0_11, %c128_12] : memref<1x1024xf32, #tpu.memory_space<vmem>>, vector<1x128xf32>
    %cst_13 = arith.constant dense<0.000000e+00> : vector<128x128xf32>
    %18 = tpu.matmul %3, %16, %cst_13 {dimension_numbers = #tpu.dot_dimension_numbers<[1], [0], [0], [1], [0, 0, 1, 1], [], []>} : vector<128x32xf32>, vector<32x128xf32>, vector<128x128xf32> -> vector<128x128xf32>
    %19 = vector.broadcast %17 : vector<1x128xf32> to vector<128x128xf32>
    %20 = arith.addf %6, %19 : vector<128x128xf32>
    %21 = arith.cmpf ogt, %18, %20 : vector<128x128xf32>
    %22 = arith.extui %21 : vector<128x128xi1> to vector<128x128xi32>
    %23 = arith.addi %15, %22 : vector<128x128xi32>
    %c0_14 = arith.constant 0 : index
    %c256 = arith.constant 256 : index
    %24 = vector.load %arg5[%c0_14, %c256] : memref<32x1024xf32, #tpu.memory_space<vmem>>, vector<32x128xf32>
    %c0_15 = arith.constant 0 : index
    %c256_16 = arith.constant 256 : index
    %25 = vector.load %arg3[%c0_15, %c256_16] : memref<1x1024xf32, #tpu.memory_space<vmem>>, vector<1x128xf32>
    %cst_17 = arith.constant dense<0.000000e+00> : vector<128x128xf32>
    %26 = tpu.matmul %3, %24, %cst_17 {dimension_numbers = #tpu.dot_dimension_numbers<[1], [0], [0], [1], [0, 0, 1, 1], [], []>} : vector<128x32xf32>, vector<32x128xf32>, vector<128x128xf32> -> vector<128x128xf32>
    %27 = vector.broadcast %25 : vector<1x128xf32> to vector<128x128xf32>
    %28 = arith.addf %6, %27 : vector<128x128xf32>
    %29 = arith.cmpf ogt, %26, %28 : vector<128x128xf32>
    %30 = arith.extui %29 : vector<128x128xi1> to vector<128x128xi32>
    %31 = arith.addi %23, %30 : vector<128x128xi32>
    %c0_18 = arith.constant 0 : index
    %c384 = arith.constant 384 : index
    %32 = vector.load %arg5[%c0_18, %c384] : memref<32x1024xf32, #tpu.memory_space<vmem>>, vector<32x128xf32>
    %c0_19 = arith.constant 0 : index
    %c384_20 = arith.constant 384 : index
    %33 = vector.load %arg3[%c0_19, %c384_20] : memref<1x1024xf32, #tpu.memory_space<vmem>>, vector<1x128xf32>
    %cst_21 = arith.constant dense<0.000000e+00> : vector<128x128xf32>
    %34 = tpu.matmul %3, %32, %cst_21 {dimension_numbers = #tpu.dot_dimension_numbers<[1], [0], [0], [1], [0, 0, 1, 1], [], []>} : vector<128x32xf32>, vector<32x128xf32>, vector<128x128xf32> -> vector<128x128xf32>
    %35 = vector.broadcast %33 : vector<1x128xf32> to vector<128x128xf32>
    %36 = arith.addf %6, %35 : vector<128x128xf32>
    %37 = arith.cmpf ogt, %34, %36 : vector<128x128xf32>
    %38 = arith.extui %37 : vector<128x128xi1> to vector<128x128xi32>
    %39 = arith.addi %31, %38 : vector<128x128xi32>
    %c0_22 = arith.constant 0 : index
    %c512 = arith.constant 512 : index
    %40 = vector.load %arg5[%c0_22, %c512] : memref<32x1024xf32, #tpu.memory_space<vmem>>, vector<32x128xf32>
    %c0_23 = arith.constant 0 : index
    %c512_24 = arith.constant 512 : index
    %41 = vector.load %arg3[%c0_23, %c512_24] : memref<1x1024xf32, #tpu.memory_space<vmem>>, vector<1x128xf32>
    %cst_25 = arith.constant dense<0.000000e+00> : vector<128x128xf32>
    %42 = tpu.matmul %3, %40, %cst_25 {dimension_numbers = #tpu.dot_dimension_numbers<[1], [0], [0], [1], [0, 0, 1, 1], [], []>} : vector<128x32xf32>, vector<32x128xf32>, vector<128x128xf32> -> vector<128x128xf32>
    %43 = vector.broadcast %41 : vector<1x128xf32> to vector<128x128xf32>
    %44 = arith.addf %6, %43 : vector<128x128xf32>
    %45 = arith.cmpf ogt, %42, %44 : vector<128x128xf32>
    %46 = arith.extui %45 : vector<128x128xi1> to vector<128x128xi32>
    %47 = arith.addi %39, %46 : vector<128x128xi32>
    %c0_26 = arith.constant 0 : index
    %c640 = arith.constant 640 : index
    %48 = vector.load %arg5[%c0_26, %c640] : memref<32x1024xf32, #tpu.memory_space<vmem>>, vector<32x128xf32>
    %c0_27 = arith.constant 0 : index
    %c640_28 = arith.constant 640 : index
    %49 = vector.load %arg3[%c0_27, %c640_28] : memref<1x1024xf32, #tpu.memory_space<vmem>>, vector<1x128xf32>
    %cst_29 = arith.constant dense<0.000000e+00> : vector<128x128xf32>
    %50 = tpu.matmul %3, %48, %cst_29 {dimension_numbers = #tpu.dot_dimension_numbers<[1], [0], [0], [1], [0, 0, 1, 1], [], []>} : vector<128x32xf32>, vector<32x128xf32>, vector<128x128xf32> -> vector<128x128xf32>
    %51 = vector.broadcast %49 : vector<1x128xf32> to vector<128x128xf32>
    %52 = arith.addf %6, %51 : vector<128x128xf32>
    %53 = arith.cmpf ogt, %50, %52 : vector<128x128xf32>
    %54 = arith.extui %53 : vector<128x128xi1> to vector<128x128xi32>
    %55 = arith.addi %47, %54 : vector<128x128xi32>
    %c0_30 = arith.constant 0 : index
    %c768 = arith.constant 768 : index
    %56 = vector.load %arg5[%c0_30, %c768] : memref<32x1024xf32, #tpu.memory_space<vmem>>, vector<32x128xf32>
    %c0_31 = arith.constant 0 : index
    %c768_32 = arith.constant 768 : index
    %57 = vector.load %arg3[%c0_31, %c768_32] : memref<1x1024xf32, #tpu.memory_space<vmem>>, vector<1x128xf32>
    %cst_33 = arith.constant dense<0.000000e+00> : vector<128x128xf32>
    %58 = tpu.matmul %3, %56, %cst_33 {dimension_numbers = #tpu.dot_dimension_numbers<[1], [0], [0], [1], [0, 0, 1, 1], [], []>} : vector<128x32xf32>, vector<32x128xf32>, vector<128x128xf32> -> vector<128x128xf32>
    %59 = vector.broadcast %57 : vector<1x128xf32> to vector<128x128xf32>
    %60 = arith.addf %6, %59 : vector<128x128xf32>
    %61 = arith.cmpf ogt, %58, %60 : vector<128x128xf32>
    %62 = arith.extui %61 : vector<128x128xi1> to vector<128x128xi32>
    %63 = arith.addi %55, %62 : vector<128x128xi32>
    %c0_34 = arith.constant 0 : index
    %c896 = arith.constant 896 : index
    %64 = vector.load %arg5[%c0_34, %c896] : memref<32x1024xf32, #tpu.memory_space<vmem>>, vector<32x128xf32>
    %c0_35 = arith.constant 0 : index
    %c896_36 = arith.constant 896 : index
    %65 = vector.load %arg3[%c0_35, %c896_36] : memref<1x1024xf32, #tpu.memory_space<vmem>>, vector<1x128xf32>
    %cst_37 = arith.constant dense<0.000000e+00> : vector<128x128xf32>
    %66 = tpu.matmul %3, %64, %cst_37 {dimension_numbers = #tpu.dot_dimension_numbers<[1], [0], [0], [1], [0, 0, 1, 1], [], []>} : vector<128x32xf32>, vector<32x128xf32>, vector<128x128xf32> -> vector<128x128xf32>
    %67 = vector.broadcast %65 : vector<1x128xf32> to vector<128x128xf32>
    %68 = arith.addf %6, %67 : vector<128x128xf32>
    %69 = arith.cmpf ogt, %66, %68 : vector<128x128xf32>
    %70 = arith.extui %69 : vector<128x128xi1> to vector<128x128xi32>
    %71 = arith.addi %63, %70 : vector<128x128xi32>
    %c0_38 = arith.constant 0 : index
    %c0_39 = arith.constant 0 : index
    %72 = vector.load %arg6[%c0_38, %c0_39] : memref<128x128xi32, #tpu.memory_space<vmem>>, vector<128x128xi32>
    tpu.vector_store %arg6[%c0_38, %c0_39], %71 {strides = array<i32>} : memref<128x128xi32, #tpu.memory_space<vmem>>, vector<128x128xi32>,
    return
  }
  func.func @transform_0(%arg0: i32, %arg1: i32) -> (i32, i32) {
    %c0_i32 = arith.constant 0 : i32
    %c0_i32_0 = arith.constant 0 : i32
    return %arg0, %c0_i32 : i32, i32
  }
  func.func @transform_1(%arg0: i32, %arg1: i32) -> (i32, i32) {
    %c0_i32 = arith.constant 0 : i32
    %c0_i32_0 = arith.constant 0 : i32
    return %c0_i32, %arg1 : i32, i32
  }
  func.func @transform_2(%arg0: i32, %arg1: i32) -> (i32, i32) {
    %c0_i32 = arith.constant 0 : i32
    %c0_i32_0 = arith.constant 0 : i32
    return %arg0, %c0_i32 : i32, i32
  }
  func.func @transform_3(%arg0: i32, %arg1: i32) -> (i32, i32) {
    %c0_i32 = arith.constant 0 : i32
    %c0_i32_0 = arith.constant 0 : i32
    return %c0_i32, %arg1 : i32, i32
  }
  func.func @transform_4(%arg0: i32, %arg1: i32) -> (i32, i32) {
    %c0_i32 = arith.constant 0 : i32
    %c0_i32_0 = arith.constant 0 : i32
    return %arg0, %c0_i32 : i32, i32
  }
}

</mosaic_0001>

<bundles_post_ra>
// kernel: _count_padded.1
= control target key start
LH: loop header
LB: loop body
LE: loop exit
PB: predicated region body
PF: predicated region fallthrough
CT: control target
= control target key end

     0   :  { %s3061_s15 = smov 0   ;;  %s3063_s16 = smov 0   ;;  %s4153_s0 = inlined_call_operand.vmem [shape: f32[256,1], index: 0, kind: input, shape index: {}]   ;;  %s4154_s1 = inlined_call_operand.vmem [shape: f32[1,1024], index: 1, kind: input, shape index: {}]   ;;  %s4155_s2 = inlined_call_operand.vmem [shape: f32[256,32], index: 2, kind: input, shape index: {}]   ;;  %s4156_s3 = inlined_call_operand.vmem [shape: f32[32,1024], index: 3, kind: input, shape index: {}]   ;;  %s4157_s4 = inlined_call_operand.vmem [shape: s32[256,128], index: 4, kind: output, shape index: {}]  }
   0x1   :  { %s3065_s17 = smov 0  }
   0x2 LB: > { %s26_s18 = sadd.s32 1, %s3029_s16  ;;  %p2359_p0 = scmp.ge.s32.totalorder %s3033_s17, 1  ;;  %s3033_s17 = sphi %s3065_s17, %s14_s17   ;;  %s3029_s16 = sphi %s3063_s16, %s4159_s16   ;;  %s3025_s15 = sphi %s3061_s15, %s4158_s15  }
   0x3   : > { %p28_p1 = scmp.ge.s32.totalorder %s26_s18, 2  ;;  %p207_p2 = scmp.lt.s32.totalorder %s3033_s17, 3 }
   0x5   : > { %s4161_s18 = smov (%p28_p1, %s26_s18), 0  ;;  %p208_p3 = pnand %p2359_p0, %p207_p2 }
   0x6   : > { %v424_v0 = vld [vmem:[%s4156_s3] sm:$0xff] (!%p208_p3)  ;;  %v693_v2 = vld [vmem:[%s4156_s3 + $0x8] sm:$0xff] (!%p208_p3)  ;;  %s2360_s25 = sshll.u32 (!%p208_p3), %s3025_s15, 4  ;;  %v3035_v7 = vmov (!%p208_p3), 0   ;;  %v913_v12 = vld [vmem:[%s4156_s3 + $0x10] sm:$0xff] (!%p208_p3)  ;;  %vm429_vm0 = vcmask (!%p208_p3), 261120  }
   0x7   : > { %211 = sbr.rel (%p208_p3) target bundleno = 363 (0x16b), region = 36  ;;  %v425_v1 = vld [vmem:[%s4156_s3 + $0x40] sm:$0xff] (!%p208_p3)  ;;  %v694_v4 = vld [vmem:[%s4156_s3 + $0x48] sm:$0xff] (!%p208_p3)  ;;  %p248_p4 = scmp.lt.s32.totalorder (!%p208_p3), %s2360_s25, 31  ;;  %3009 = vset.pattern.permute.xlu0 (!%p208_p3), %v3035_v7  ;;  %3010 = vset.pattern.permute.xlu1 (!%p208_p3), %v3035_v7  ;;  %v914_v14 = vld [vmem:[%s4156_s3 + $0x50] sm:$0xff] (!%p208_p3) }
   0x8   : > { %v2920_v3 = vpack.c.bf16 (!%p208_p3), %v425_v1, %v424_v0  ;;  %v426_v5 = vld [vmem:[%s4156_s3 + $0x80] sm:$0xff] (!%p208_p3)  ;;  %v2928_v8 = vpack.c.bf16 (!%p208_p3), %v694_v4, %v693_v2  ;;  %v695_v10 = vld [vmem:[%s4156_s3 + $0x88] sm:$0xff] (!%p208_p3)  ;;  %v1133_v15 = vld [vmem:[%s4156_s3 + $0x18] sm:$0xff] (!%p208_p3)  ;;  %v2936_v17 = vpack.c.bf16 (!%p208_p3), %v914_v14, %v913_v12 }
   0x9   : > { %v427_v6 = vld [vmem:[%s4156_s3 + $0xc0] sm:$0xff] (!%p208_p3)  ;;  %v696_v11 = vld [vmem:[%s4156_s3 + $0xc8] sm:$0xff] (!%p208_p3)  ;;  %v1134_v16 = vld [vmem:[%s4156_s3 + $0x58] sm:$0xff] (!%p208_p3) }
   0xa   : > { %v2924_v9 = vpack.c.bf16 (!%p208_p3), %v427_v6, %v426_v5  ;;  %2921 = vmatprep.subr.bf16.mxu0 (!%p208_p3), %v2920_v3  ;;  %v2932_v13 = vpack.c.bf16 (!%p208_p3), %v696_v11, %v695_v10  ;;  %2929 = vmatprep.subr.bf16.mxu1 (!%p208_p3), %v2928_v8  ;;  %v2944_v18 = vpack.c.bf16 (!%p208_p3), %v1134_v16, %v1133_v15  ;;  %v915_v20 = vld [vmem:[%s4156_s3 + $0x90] sm:$0xff] (!%p208_p3)  ;;  %v1135_v23 = vld [vmem:[%s4156_s3 + $0x98] sm:$0xff] (!%p208_p3)  ;;  %v1353_v28 = vld [vmem:[%s4156_s3 + $0x20] sm:$0xff] (!%p208_p3) }
   0xb   : > { %2923 = vmatpush3.bf16.msra.mxu0 (!%p208_p3), %v2920_v3  ;;  %2931 = vmatpush3.bf16.msra.mxu1 (!%p208_p3), %v2928_v8  ;;  %v916_v21 = vld [vmem:[%s4156_s3 + $0xd0] sm:$0xff] (!%p208_p3)  ;;  %v1136_v24 = vld [vmem:[%s4156_s3 + $0xd8] sm:$0xff] (!%p208_p3)  ;;  %v1354_v29 = vld [vmem:[%s4156_s3 + $0x60] sm:$0xff] (!%p208_p3) }
   0xc   : > { %2925 = vmatprep.subr.bf16.mxu0 (!%p208_p3), %v2924_v9  ;;  %2933 = vmatprep.subr.bf16.mxu1 (!%p208_p3), %v2932_v13  ;;  %v2940_v26 = vpack.c.bf16 (!%p208_p3), %v916_v21, %v915_v20  ;;  %v2948_v27 = vpack.c.bf16 (!%p208_p3), %v1136_v24, %v1135_v23  ;;  %v1573_v31 = vld [vmem:[%s4156_s3 + $0x28] sm:$0xff] (!%p208_p3)  ;;  %v3179_v34 = vpack.c.bf16 (!%p208_p3), %v1354_v29, %v1353_v28  ;;  %v1355_v58 = vld [vmem:[%s4156_s3 + $0xa0] sm:$0xff] (!%p208_p3)  ;;  %v1793_v1 = vld [vmem:[%s4156_s3 + $0x30] sm:$0xff] (!%p208_p3) }
   0xd   : > { %v1574_v32 = vld [vmem:[%s4156_s3 + $0x68] sm:$0xff] (!%p208_p3)  ;;  %v1356_v59 = vld [vmem:[%s4156_s3 + $0xe0] sm:$0xff] (!%p208_p3)  ;;  %v1794_v2 = vld [vmem:[%s4156_s3 + $0x70] sm:$0xff] (!%p208_p3) }
   0xe   : > { %s4163_s25 = smov (!%p248_p4, %s2360_s25), 31  ;;  %v3183_v35 = vpack.c.bf16 %v1574_v32, %v1573_v31  ;;  %v1575_v61 = vld [vmem:[%s4156_s3 + $0xa8] sm:$0xff]  ;;  %v2956_v63 = vpack.c.bf16 %v1356_v59, %v1355_v58  ;;  %v2013_v3 = vld [vmem:[%s4156_s3 + $0x38] sm:$0xff]  ;;  %v2968_v5 = vpack.c.bf16 %v1794_v2, %v1793_v1  ;;  %v1795_v12 = vld [vmem:[%s4156_s3 + $0xb0] sm:$0xff] }
   0xf   : > { %s3120_s21 = sshll.u32 %s4163_s25, 3  ;;  %2927 = vmatpush3.bf16.msra.mxu0 %v2924_v9  ;;  %2935 = vmatpush3.bf16.msra.mxu1 %v2932_v13  ;;  %v1576_v62 = vld [vmem:[%s4156_s3 + $0xe8] sm:$0xff]  ;;  %v2014_v4 = vld [vmem:[%s4156_s3 + $0x78] sm:$0xff]  ;;  %v1796_v13 = vld [vmem:[%s4156_s3 + $0xf0] sm:$0xff] }
  0x10   : > { %s3126_s24 = scalar_lea.vmem %s4155_s2, %s3120_s21  ;;  %2937 = vmatprep.subr.bf16.mxu0 %v2936_v17  ;;  %2945 = vmatprep.subr.bf16.mxu1 %v2944_v18  ;;  %s3189_s20 = scalar_lea.vmem %s4153_s0, %s3120_s21  ;;  %v2964_v0 = vpack.c.bf16 %v1576_v62, %v1575_v61  ;;  %v2976_v6 = vpack.c.bf16 %v2014_v4, %v2013_v3  ;;  %v2015_v14 = vld [vmem:[%s4156_s3 + $0xb8] sm:$0xff]  ;;  %v2972_v16 = vpack.c.bf16 %v1796_v13, %v1795_v12  ;;  %v3537_v24 = vld [vmem:[%s4154_s1] ss:$0 sm:$0xff] }
  0x11   : > { %v3129_v19 = vld [vmem:[%s3126_s24] sm:$0xff]  ;;  %v3140_v22 = vld [vmem:[%s3126_s24 + $0x8] sm:$0xff]  ;;  %v3151_v25 = vld [vmem:[%s3126_s24 + $0x10] sm:$0xff]  ;;  %s4027_s19 = scalar_lea.vmem %s4157_s4, %s3120_s21 }
  0x12   : > { %2672 = vmatprep.mubr.msk.f32.mxu0 %vm429_vm0, %v3129_v19  ;;  %2704 = vmatprep.mubr.msk.f32.mxu1 %vm429_vm0, %v3129_v19  ;;  %v3164_v30 = vld [vmem:[%s3126_s24 + $0x18] sm:$0xff]  ;;  %v3177_v33 = vld [vmem:[%s3126_s24 + $0x20] sm:$0xff]  ;;  %v3196_v36 = vld [vmem:[%s3126_s24 + $0x28] sm:$0xff] }
  0x13   : > { %2673 = vmatmul.mubr.msk.f32.vlgmr.msra.gmra.mrb[0].mxu0 %vm429_vm0, %v3140_v22  ;;  %2705 = vmatmul.mubr.msk.f32.vlgmr.msra.gmra.mrb[0].mxu1 %vm429_vm0, %v3140_v22  ;;  %v3201_v37 = vld [vmem:[%s3126_s24 + $0x30] sm:$0xff]  ;;  %v312_v38 = vld [vmem:[%s3189_s20] sm:$0xff]  ;;  %v3214_v40 = vld [vmem:[%s3126_s24 + $0x38] sm:$0xff] }
  0x14   : > { %2939 = vmatpush3.bf16.msra.mxu0 %v2936_v17  ;;  %2675 = vmatprep.mubr.msk.f32.mxu0 %vm429_vm0, %v3151_v25  ;;  %v314_v39 = vld [vmem:[%s3189_s20 + $0x10] sm:$0xff]  ;;  %v3219_v41 = vld [vmem:[%s3126_s24 + $0x40] sm:$0xff]  ;;  %v313_v42 = vld [vmem:[%s3189_s20 + $0x8] sm:$0xff] }
  0x15   : > { %2707 = vmatprep.mubr.msk.f32.mxu1 %vm429_vm0, %v3151_v25  ;;  %2947 = vmatpush3.bf16.msra.mxu1 %v2944_v18  ;;  %v315_v43 = vld [vmem:[%s3189_s20 + $0x18] sm:$0xff]  ;;  %v3230_v44 = vld [vmem:[%s3126_s24 + $0x48] sm:$0xff]  ;;  %v3235_v45 = vld [vmem:[%s3126_s24 + $0x50] sm:$0xff] }
  0x16   : > { %2941 = vmatprep.subr.bf16.mxu0 %v2940_v26  ;;  %2949 = vmatprep.subr.bf16.mxu1 %v2948_v27  ;;  %v316_v46 = vld [vmem:[%s3189_s20 + $0x20] sm:$0xff]  ;;  %v317_v47 = vld [vmem:[%s3189_s20 + $0x28] sm:$0xff]  ;;  %v3246_v48 = vld [vmem:[%s3126_s24 + $0x58] sm:$0xff] }
  0x17   : > { %2676 = vmatmul.mubr.msk.f32.gmra.mrb[2].mxu0 %vm429_vm0, %v3164_v30  ;;  %2708 = vmatmul.mubr.msk.f32.gmra.mrb[2].mxu1 %vm429_vm0, %v3164_v30  ;;  %v3251_v49 = vld [vmem:[%s3126_s24 + $0x60] sm:$0xff]  ;;  %v318_v50 = vld [vmem:[%s3189_s20 + $0x30] sm:$0xff]  ;;  %v319_v51 = vld [vmem:[%s3189_s20 + $0x38] sm:$0xff] }
  0x18   : > { %2678 = vmatprep.mubr.msk.f32.mxu0 %vm429_vm0, %v3177_v33  ;;  %2710 = vmatprep.mubr.msk.f32.mxu1 %vm429_vm0, %v3177_v33  ;;  %v3262_v52 = vld [vmem:[%s3126_s24 + $0x68] sm:$0xff]  ;;  %v3267_v53 = vld [vmem:[%s3126_s24 + $0x70] sm:$0xff]  ;;  %v320_v54 = vld [vmem:[%s3189_s20 + $0x40] sm:$0xff] }
  0x19   : > { %2943 = vmatpush3.bf16.msra.mxu0 %v2940_v26  ;;  %2951 = vmatpush3.bf16.msra.mxu1 %v2948_v27  ;;  %v321_v55 = vld [vmem:[%s3189_s20 + $0x48] sm:$0xff]  ;;  %v3278_v56 = vld [vmem:[%s3126_s24 + $0x78] sm:$0xff]  ;;  %v322_v57 = vld [vmem:[%s3189_s20 + $0x50] sm:$0xff] }
  0x1a   : > { %2953 = vmatprep.subr.bf16.mxu0 %v3179_v34  ;;  %2961 = vmatprep.subr.bf16.mxu1 %v3183_v35  ;;  %v323_v60 = vld [vmem:[%s3189_s20 + $0x58] sm:$0xff]  ;;  %v325_v8 = vld [vmem:[%s3189_s20 + $0x68] sm:$0xff]  ;;  %v324_v9 = vld [vmem:[%s3189_s20 + $0x60] sm:$0xff] }
  0x1b   : > { %2679 = vmatmul.mubr.msk.f32.gmra.mrb[4].mxu0 %vm429_vm0, %v3196_v36  ;;  %2711 = vmatmul.mubr.msk.f32.gmra.mrb[4].mxu1 %vm429_vm0, %v3196_v36  ;;  %v327_v10 = vld [vmem:[%s3189_s20 + $0x78] sm:$0xff]  ;;  %v326_v11 = vld [vmem:[%s3189_s20 + $0x70] sm:$0xff] }
  0x1c   : > { %2681 = vmatprep.mubr.msk.f32.mxu0 %vm429_vm0, %v3201_v37  ;;  %2713 = vmatprep.mubr.msk.f32.mxu1 %vm429_vm0, %v3201_v37  ;;  %v2016_v15 = vld [vmem:[%s4156_s3 + $0xf8] sm:$0xff] }
  0x1d   : > { %330 = vperm.xlu0 %3009, %v312_v38   ;;  %340 = vperm.xlu1 %3010, %v314_v39   ;;  %v2980_v17 = vpack.c.bf16 %v2016_v15, %v2015_v14 }
  0x1f   : > { %2682 = vmatmul.mubr.msk.f32.gmra.mrb[6].mxu0 %vm429_vm0, %v3214_v40  ;;  %2714 = vmatmul.mubr.msk.f32.gmra.mrb[6].mxu1 %vm429_vm0, %v3214_v40 }
  0x20   : > { %2684 = vmatprep.mubr.msk.f32.mxu0 %vm429_vm0, %v3219_v41  ;;  %2716 = vmatprep.mubr.msk.f32.mxu1 %vm429_vm0, %v3219_v41 }
  0x21   : > { %335 = vperm.xlu0 %3009, %v313_v42   ;;  %345 = vperm.xlu1 %3010, %v315_v43  }
  0x23   : > { %2685 = vmatmul.mubr.msk.f32.gmra.mrb[8].mxu0 %vm429_vm0, %v3230_v44  ;;  %2717 = vmatmul.mubr.msk.f32.gmra.mrb[8].mxu1 %vm429_vm0, %v3230_v44 }
  0x24   : > { %2687 = vmatprep.mubr.msk.f32.mxu0 %vm429_vm0, %v3235_v45  ;;  %2719 = vmatprep.mubr.msk.f32.mxu1 %vm429_vm0, %v3235_v45 }
  0x25   : > { %350 = vperm.xlu0 %3009, %v316_v46   ;;  %355 = vperm.xlu1 %3010, %v317_v47  }
  0x27   : > { %2688 = vmatmul.mubr.msk.f32.gmra.mrb[10].mxu0 %vm429_vm0, %v3246_v48  ;;  %2720 = vmatmul.mubr.msk.f32.gmra.mrb[10].mxu1 %vm429_vm0, %v3246_v48 }
  0x28   : > { %2690 = vmatprep.mubr.msk.f32.mxu0 %vm429_vm0, %v3251_v49  ;;  %2722 = vmatprep.mubr.msk.f32.mxu1 %vm429_vm0, %v3251_v49 }
  0x29   : > { %360 = vperm.xlu0 %3009, %v318_v50   ;;  %365 = vperm.xlu1 %3010, %v319_v51  }
  0x2b   : > { %2691 = vmatmul.mubr.msk.f32.gmra.mrb[12].mxu0 %vm429_vm0, %v3262_v52  ;;  %2723 = vmatmul.mubr.msk.f32.gmra.mrb[12].mxu1 %vm429_vm0, %v3262_v52 }
  0x2c   : > { %2693 = vmatprep.mubr.msk.f32.mxu0 %vm429_vm0, %v3267_v53  ;;  %2725 = vmatprep.mubr.msk.f32.mxu1 %vm429_vm0, %v3267_v53 }
  0x2d   : > { %370 = vperm.xlu0 %3009, %v320_v54   ;;  %375 = vperm.xlu1 %3010, %v321_v55  }
  0x2f   : > { %2694 = vmatmul.mubr.msk.f32.gmra.mrb[14].mxu0 %vm429_vm0, %v3278_v56  ;;  %2726 = vmatmul.mubr.msk.f32.gmra.mrb[14].mxu1 %vm429_vm0, %v3278_v56 }
  0x30   : > { %2736 = vmatprep.mubr.msk.f32.mxu0 %vm429_vm0, %v3129_v19  ;;  %2768 = vmatprep.mubr.msk.f32.mxu1 %vm429_vm0, %v3129_v19 }
  0x31   : > { %380 = vperm.xlu0 %3009, %v322_v57   ;;  %385 = vperm.xlu1 %3010, %v323_v60  }
  0x33   : > { %2737 = vmatmul.mubr.msk.f32.vlgmr.msra.gmra.mrb[16].mxu0 %vm429_vm0, %v3140_v22  ;;  %2769 = vmatmul.mubr.msk.f32.vlgmr.msra.gmra.mrb[16].mxu1 %vm429_vm0, %v3140_v22 }
  0x34   : > { %2955 = vmatpush3.bf16.msra.mxu0 %v3179_v34  ;;  %2739 = vmatprep.mubr.msk.f32.mxu0 %vm429_vm0, %v3151_v25 }
  0x35   : > { %2771 = vmatprep.mubr.msk.f32.mxu1 %vm429_vm0, %v3151_v25  ;;  %2963 = vmatpush3.bf16.msra.mxu1 %v3183_v35 }
  0x36   : > { %2957 = vmatprep.subr.bf16.mxu0 %v2956_v63  ;;  %2965 = vmatprep.subr.bf16.mxu1 %v2964_v0 }
  0x37   : > { %2740 = vmatmul.mubr.msk.f32.gmra.mrb[18].mxu0 %vm429_vm0, %v3164_v30  ;;  %2772 = vmatmul.mubr.msk.f32.gmra.mrb[18].mxu1 %vm429_vm0, %v3164_v30 }
  0x38   : > { %2742 = vmatprep.mubr.msk.f32.mxu0 %vm429_vm0, %v3177_v33  ;;  %2774 = vmatprep.mubr.msk.f32.mxu1 %vm429_vm0, %v3177_v33 }
  0x39   : > { %2959 = vmatpush3.bf16.msra.mxu0 %v2956_v63  ;;  %2967 = vmatpush3.bf16.msra.mxu1 %v2964_v0 }
  0x3a   : > { %2969 = vmatprep.subr.bf16.mxu0 %v2968_v5  ;;  %2977 = vmatprep.subr.bf16.mxu1 %v2976_v6 }
  0x3b   : > { %2743 = vmatmul.mubr.msk.f32.gmra.mrb[20].mxu0 %vm429_vm0, %v3196_v36  ;;  %2775 = vmatmul.mubr.msk.f32.gmra.mrb[20].mxu1 %vm429_vm0, %v3196_v36 }
  0x3c   : > { %2745 = vmatprep.mubr.msk.f32.mxu0 %vm429_vm0, %v3201_v37  ;;  %2777 = vmatprep.mubr.msk.f32.mxu1 %vm429_vm0, %v3201_v37 }
  0x3d   : > { %395 = vperm.xlu1 %3010, %v325_v8   ;;  %390 = vperm.xlu0 %3009, %v324_v9  }
  0x3f   : > { %2746 = vmatmul.mubr.msk.f32.gmra.mrb[22].mxu0 %vm429_vm0, %v3214_v40  ;;  %2778 = vmatmul.mubr.msk.f32.gmra.mrb[22].mxu1 %vm429_vm0, %v3214_v40 }
  0x40   : > { %2748 = vmatprep.mubr.msk.f32.mxu0 %vm429_vm0, %v3219_v41  ;;  %2780 = vmatprep.mubr.msk.f32.mxu1 %vm429_vm0, %v3219_v41 }
  0x41   : > { %405 = vperm.xlu1 %3010, %v327_v10   ;;  %400 = vperm.xlu0 %3009, %v326_v11  }
  0x43   : > { %2749 = vmatmul.mubr.msk.f32.gmra.mrb[24].mxu0 %vm429_vm0, %v3230_v44  ;;  %2781 = vmatmul.mubr.msk.f32.gmra.mrb[24].mxu1 %vm429_vm0, %v3230_v44 }
  0x44   : > { %2751 = vmatprep.mubr.msk.f32.mxu0 %vm429_vm0, %v3235_v45  ;;  %2783 = vmatprep.mubr.msk.f32.mxu1 %vm429_vm0, %v3235_v45 }
  0x47   : > { %2752 = vmatmul.mubr.msk.f32.gmra.mrb[26].mxu0 %vm429_vm0, %v3246_v48  ;;  %2784 = vmatmul.mubr.msk.f32.gmra.mrb[26].mxu1 %vm429_vm0, %v3246_v48 }
  0x48   : > { %2754 = vmatprep.mubr.msk.f32.mxu0 %vm429_vm0, %v3251_v49  ;;  %2786 = vmatprep.mubr.msk.f32.mxu1 %vm429_vm0, %v3251_v49 }
  0x4b   : > { %2755 = vmatmul.mubr.msk.f32.gmra.mrb[28].mxu0 %vm429_vm0, %v3262_v52  ;;  %2787 = vmatmul.mubr.msk.f32.gmra.mrb[28].mxu1 %vm429_vm0, %v3262_v52 }
  0x4c   : > { %2757 = vmatprep.mubr.msk.f32.mxu0 %vm429_vm0, %v3267_v53  ;;  %2789 = vmatprep.mubr.msk.f32.mxu1 %vm429_vm0, %v3267_v53 }
  0x4f   : > { %2758 = vmatmul.mubr.msk.f32.gmra.mrb[30].mxu0 %vm429_vm0, %v3278_v56  ;;  %2790 = vmatmul.mubr.msk.f32.gmra.mrb[30].mxu1 %vm429_vm0, %v3278_v56 }
  0x50   : > { %2800 = vmatprep.mubr.msk.f32.mxu0 %vm429_vm0, %v3129_v19  ;;  %2832 = vmatprep.mubr.msk.f32.mxu1 %vm429_vm0, %v3129_v19 }
  0x53   : > { %2801 = vmatmul.mubr.msk.f32.vlgmr.msra.gmra.mrb[32].mxu0 %vm429_vm0, %v3140_v22  ;;  %2833 = vmatmul.mubr.msk.f32.vlgmr.msra.gmra.mrb[32].mxu1 %vm429_vm0, %v3140_v22 }
  0x54   : > { %2971 = vmatpush3.bf16.msra.mxu0 %v2968_v5  ;;  %2803 = vmatprep.mubr.msk.f32.mxu0 %vm429_vm0, %v3151_v25 }
  0x55   : > { %2835 = vmatprep.mubr.msk.f32.mxu1 %vm429_vm0, %v3151_v25  ;;  %2979 = vmatpush3.bf16.msra.mxu1 %v2976_v6 }
  0x56   : > { %2973 = vmatprep.subr.bf16.mxu0 %v2972_v16  ;;  %2981 = vmatprep.subr.bf16.mxu1 %v2980_v17 }
  0x57   : > { %2804 = vmatmul.mubr.msk.f32.gmra.mrb[34].mxu0 %vm429_vm0, %v3164_v30  ;;  %2836 = vmatmul.mubr.msk.f32.gmra.mrb[34].mxu1 %vm429_vm0, %v3164_v30 }
  0x58   : > { %2806 = vmatprep.mubr.msk.f32.mxu0 %vm429_vm0, %v3177_v33  ;;  %2838 = vmatprep.mubr.msk.f32.mxu1 %vm429_vm0, %v3177_v33 }
  0x59   : > { %2975 = vmatpush3.bf16.msra.mxu0 %v2972_v16  ;;  %2983 = vmatpush3.bf16.msra.mxu1 %v2980_v17 }
  0x5b   : > { %2807 = vmatmul.mubr.msk.f32.gmra.mrb[36].mxu0 %vm429_vm0, %v3196_v36  ;;  %2839 = vmatmul.mubr.msk.f32.gmra.mrb[36].mxu1 %vm429_vm0, %v3196_v36 }
  0x5c   : > { %2809 = vmatprep.mubr.msk.f32.mxu0 %vm429_vm0, %v3201_v37  ;;  %2841 = vmatprep.mubr.msk.f32.mxu1 %vm429_vm0, %v3201_v37 }
  0x5f   : > { %2810 = vmatmul.mubr.msk.f32.gmra.mrb[38].mxu0 %vm429_vm0, %v3214_v40  ;;  %2842 = vmatmul.mubr.msk.f32.gmra.mrb[38].mxu1 %vm429_vm0, %v3214_v40 }
  0x60   : > { %2812 = vmatprep.mubr.msk.f32.mxu0 %vm429_vm0, %v3219_v41  ;;  %2844 = vmatprep.mubr.msk.f32.mxu1 %vm429_vm0, %v3219_v41 }
  0x63   : > { %2813 = vmatmul.mubr.msk.f32.gmra.mrb[40].mxu0 %vm429_vm0, %v3230_v44  ;;  %2845 = vmatmul.mubr.msk.f32.gmra.mrb[40].mxu1 %vm429_vm0, %v3230_v44 }
  0x64   : > { %2815 = vmatprep.mubr.msk.f32.mxu0 %vm429_vm0, %v3235_v45  ;;  %2847 = vmatprep.mubr.msk.f32.mxu1 %vm429_vm0, %v3235_v45 }
  0x67   : > { %2816 = vmatmul.mubr.msk.f32.gmra.mrb[42].mxu0 %vm429_vm0, %v3246_v48  ;;  %2848 = vmatmul.mubr.msk.f32.gmra.mrb[42].mxu1 %vm429_vm0, %v3246_v48 }
  0x68   : > { %2818 = vmatprep.mubr.msk.f32.mxu0 %vm429_vm0, %v3251_v49  ;;  %2850 = vmatprep.mubr.msk.f32.mxu1 %vm429_vm0, %v3251_v49 }
  0x6b   : > { %2819 = vmatmul.mubr.msk.f32.gmra.mrb[44].mxu0 %vm429_vm0, %v3262_v52  ;;  %2851 = vmatmul.mubr.msk.f32.gmra.mrb[44].mxu1 %vm429_vm0, %v3262_v52 }
  0x6c   : > { %2821 = vmatprep.mubr.msk.f32.mxu0 %vm429_vm0, %v3267_v53  ;;  %2853 = vmatprep.mubr.msk.f32.mxu1 %vm429_vm0, %v3267_v53 }
  0x6f   : > { %2822 = vmatmul.mubr.msk.f32.gmra.mrb[46].mxu0 %vm429_vm0, %v3278_v56  ;;  %2854 = vmatmul.mubr.msk.f32.gmra.mrb[46].mxu1 %vm429_vm0, %v3278_v56 }
  0x70   : > { %2864 = vmatprep.mubr.msk.f32.mxu0 %vm429_vm0, %v3129_v19  ;;  %2896 = vmatprep.mubr.msk.f32.mxu1 %vm429_vm0, %v3129_v19 }
  0x73   : > { %2865 = vmatmul.mubr.msk.f32.vlgmr.msra.gmra.mrb[48].mxu0 %vm429_vm0, %v3140_v22  ;;  %2897 = vmatmul.mubr.msk.f32.vlgmr.msra.gmra.mrb[48].mxu1 %vm429_vm0, %v3140_v22 }
  0x74   : > { %2867 = vmatprep.mubr.msk.f32.mxu0 %vm429_vm0, %v3151_v25  ;;  %2899 = vmatprep.mubr.msk.f32.mxu1 %vm429_vm0, %v3151_v25  ;;  %v3542_v25 = vld [vmem:[%s4154_s1 + $0x1] ss:$0 sm:$0xff] }
  0x77   : > { %2868 = vmatmul.mubr.msk.f32.gmra.mrb[50].mxu0 %vm429_vm0, %v3164_v30  ;;  %2900 = vmatmul.mubr.msk.f32.gmra.mrb[50].mxu1 %vm429_vm0, %v3164_v30 }
  0x78   : > { %2870 = vmatprep.mubr.msk.f32.mxu0 %vm429_vm0, %v3177_v33  ;;  %2902 = vmatprep.mubr.msk.f32.mxu1 %vm429_vm0, %v3177_v33 }
  0x7b   : > { %2871 = vmatmul.mubr.msk.f32.gmra.mrb[52].mxu0 %vm429_vm0, %v3196_v36  ;;  %2903 = vmatmul.mubr.msk.f32.gmra.mrb[52].mxu1 %vm429_vm0, %v3196_v36 }
  0x7c   : > { %2873 = vmatprep.mubr.msk.f32.mxu0 %vm429_vm0, %v3201_v37  ;;  %2905 = vmatprep.mubr.msk.f32.mxu1 %vm429_vm0, %v3201_v37 }
  0x7f   : > { %2874 = vmatmul.mubr.msk.f32.gmra.mrb[54].mxu0 %vm429_vm0, %v3214_v40  ;;  %2906 = vmatmul.mubr.msk.f32.gmra.mrb[54].mxu1 %vm429_vm0, %v3214_v40 }
  0x80   : > { %2876 = vmatprep.mubr.msk.f32.mxu0 %vm429_vm0, %v3219_v41  ;;  %2908 = vmatprep.mubr.msk.f32.mxu1 %vm429_vm0, %v3219_v41 }
  0x83   : > { %2877 = vmatmul.mubr.msk.f32.gmra.mrb[56].mxu0 %vm429_vm0, %v3230_v44  ;;  %2909 = vmatmul.mubr.msk.f32.gmra.mrb[56].mxu1 %vm429_vm0, %v3230_v44 }
  0x84   : > { %2879 = vmatprep.mubr.msk.f32.mxu0 %vm429_vm0, %v3235_v45  ;;  %2911 = vmatprep.mubr.msk.f32.mxu1 %vm429_vm0, %v3235_v45 }
  0x87   : > { %2880 = vmatmul.mubr.msk.f32.gmra.mrb[58].mxu0 %vm429_vm0, %v3246_v48  ;;  %2912 = vmatmul.mubr.msk.f32.gmra.mrb[58].mxu1 %vm429_vm0, %v3246_v48 }
  0x88   : > { %2882 = vmatprep.mubr.msk.f32.mxu0 %vm429_vm0, %v3251_v49  ;;  %2914 = vmatprep.mubr.msk.f32.mxu1 %vm429_vm0, %v3251_v49 }
  0x8b   : > { %2883 = vmatmul.mubr.msk.f32.gmra.mrb[60].mxu0 %vm429_vm0, %v3262_v52  ;;  %2915 = vmatmul.mubr.msk.f32.gmra.mrb[60].mxu1 %vm429_vm0, %v3262_v52 }
  0x8c   : > { %2885 = vmatprep.mubr.msk.f32.mxu0 %vm429_vm0, %v3267_v53  ;;  %2917 = vmatprep.mubr.msk.f32.mxu1 %vm429_vm0, %v3267_v53 }
  0x8f   : > { %2886 = vmatmul.mubr.msk.f32.gmra.mrb[62].mxu0 %vm429_vm0, %v3278_v56  ;;  %2918 = vmatmul.mubr.msk.f32.gmra.mrb[62].mxu1 %vm429_vm0, %v3278_v56 }
  0x9c   : > { %v3522_v18 = vpop.permute.xlu1 %340  ;;  %v3524_v19 = vpop.permute.xlu0 %330 }
  0x9d   : > { %v629_v28 = vadd.f32 %v3537_v24, %v3524_v19  ;;  %v849_v31 = vadd.f32 %v3542_v25, %v3524_v19  ;;  %v631_v36 = vadd.f32 %v3537_v24, %v3522_v18  ;;  %v851_v37 = vadd.f32 %v3542_v25, %v3522_v18 }
  0xa0   : > { %v3526_v20 = vpop.permute.xlu1 %345  ;;  %v3528_v21 = vpop.permute.xlu0 %335 }
  0xa1   : > { %v630_v27 = vadd.f32 %v3537_v24, %v3528_v21  ;;  %v850_v29 = vadd.f32 %v3542_v25, %v3528_v21  ;;  %v632_v35 = vadd.f32 %v3537_v24, %v3526_v20  ;;  %v852_v40 = vadd.f32 %v3542_v25, %v3526_v20 }
  0xa4   : > { %v3530_v22 = vpop.permute.xlu1 %355  ;;  %v3532_v23 = vpop.permute.xlu0 %350 }
  0xa5   : > { %v633_v46 = vadd.f32 %v3537_v24, %v3532_v23  ;;  %v853_v47 = vadd.f32 %v3542_v25, %v3532_v23  ;;  %v634_v52 = vadd.f32 %v3537_v24, %v3530_v22  ;;  %v854_v53 = vadd.f32 %v3542_v25, %v3530_v22 }
  0xa8   : > { %v3544_v26 = vpop.permute.xlu1 %365  ;;  %v3552_v30 = vpop.permute.xlu0 %360 }
  0xa9   : > { %v635_v61 = vadd.f32 %v3537_v24, %v3552_v30  ;;  %v855_v62 = vadd.f32 %v3542_v25, %v3552_v30  ;;  %v636_v3 = vadd.f32 %v3537_v24, %v3544_v26  ;;  %v856_v4 = vadd.f32 %v3542_v25, %v3544_v26 }
  0xac   : > { %v3565_v41 = vpop.permute.xlu1 %375  ;;  %v3574_v48 = vpop.permute.xlu0 %370 }
  0xad   : > { %v637_v14 = vadd.f32 %v3537_v24, %v3574_v48  ;;  %v857_v15 = vadd.f32 %v3542_v25, %v3574_v48 }
  0xb0   : > { %v3592_v63 = vpop.permute.xlu1 %385  ;;  %v3603_v9 = vpop.permute.xlu0 %380 }
  0xe6   : > { %v2674_v32 = vpop.f32.mrb[0].mxu0  ;;  %v2706_v34 = vpop.f32.mrb[0].mxu1 }
  0xe7   : > { %vm646_vm1 = vcmp.gt.f32.partialorder %v2674_v32, %v630_v27  ;;  %v544_v33 = vpop.f32.mrb[1].mxu0  ;;  %vm866_vm3 = vcmp.gt.f32.partialorder %v2706_v34, %v850_v29  ;;  %v764_v39 = vpop.f32.mrb[1].mxu1  ;;  %v858_v29 = vadd.f32 %v3542_v25, %v3565_v41 }
  0xe8   : > { %v662_v38 = vsel %vm646_vm1, 1, %v3035_v7  ;;  %vm645_vm2 = vcmp.gt.f32.partialorder %v544_v33, %v629_v28  ;;  %v882_v43 = vsel %vm866_vm3, 1, %v3035_v7  ;;  %vm865_vm4 = vcmp.gt.f32.partialorder %v764_v39, %v849_v31  ;;  %v3621_v34 = vpop.permute.xlu1 %395 }
  0xe9   : > { %v661_v42 = vsel %vm645_vm2, 1, %v3035_v7  ;;  %v881_v44 = vsel %vm865_vm4, 1, %v3035_v7  ;;  %v3576_v49 = vadd.s32 %v882_v43, %v662_v38  ;;  %v638_v28 = vadd.f32 %v3537_v24, %v3565_v41 }
  0xea   : > { %v2677_v45 = vpop.f32.mrb[2].mxu0  ;;  %v2709_v51 = vpop.f32.mrb[2].mxu1  ;;  %v3582_v54 = vadd.s32 %v881_v44, %v661_v42  ;;  %v639_v39 = vadd.f32 %v3537_v24, %v3603_v9 }
  0xeb   : > { %vm648_vm5 = vcmp.gt.f32.partialorder %v2677_v45, %v632_v35  ;;  %v554_v50 = vpop.f32.mrb[3].mxu0  ;;  %vm868_vm7 = vcmp.gt.f32.partialorder %v2709_v51, %v852_v40  ;;  %v774_v56 = vpop.f32.mrb[3].mxu1  ;;  %v859_v40 = vadd.f32 %v3542_v25, %v3603_v9 }
  0xec   : > { %v664_v55 = vsel %vm648_vm5, 1, %v3035_v7  ;;  %vm647_vm6 = vcmp.gt.f32.partialorder %v554_v50, %v631_v36  ;;  %v884_v58 = vsel %vm868_vm7, 1, %v3035_v7  ;;  %vm867_vm8 = vcmp.gt.f32.partialorder %v774_v56, %v851_v37  ;;  %v3630_v42 = vpop.permute.xlu0 %390 }
  0xed   : > { %v663_v57 = vsel %vm647_vm6, 1, %v3035_v7  ;;  %v883_v59 = vsel %vm867_vm8, 1, %v3035_v7  ;;  %v3594_v0 = vadd.s32 %v884_v58, %v664_v55  ;;  %v642_v58 = vadd.f32 %v3537_v24, %v3621_v34 }
  0xee   : > { %v2680_v60 = vpop.f32.mrb[4].mxu0  ;;  %v2712_v2 = vpop.f32.mrb[4].mxu1  ;;  %v3600_v5 = vadd.s32 %v883_v59, %v663_v57  ;;  %v862_v59 = vadd.f32 %v3542_v25, %v3621_v34 }
  0xef   : > { %vm650_vm9 = vcmp.gt.f32.partialorder %v2680_v60, %v634_v52  ;;  %v564_v1 = vpop.f32.mrb[5].mxu0  ;;  %vm870_vm11 = vcmp.gt.f32.partialorder %v2712_v2, %v854_v53  ;;  %v784_v8 = vpop.f32.mrb[5].mxu1  ;;  %v641_v2 = vadd.f32 %v3537_v24, %v3630_v42 }
  0xf0   : > { %v666_v6 = vsel %vm650_vm9, 1, %v3035_v7  ;;  %vm649_vm10 = vcmp.gt.f32.partialorder %v564_v1, %v633_v46  ;;  %v886_v11 = vsel %vm870_vm11, 1, %v3035_v7  ;;  %vm869_vm12 = vcmp.gt.f32.partialorder %v784_v8, %v853_v47  ;;  %v3648_v60 = vpop.permute.xlu1 %405 }
  0xf1   : > { %v665_v10 = vsel %vm649_vm10, 1, %v3035_v7  ;;  %v885_v12 = vsel %vm869_vm12, 1, %v3035_v7  ;;  %v3612_v16 = vadd.s32 %v886_v11, %v666_v6  ;;  %v640_v46 = vadd.f32 %v3537_v24, %v3592_v63 }
  0xf2   : > { %v2683_v13 = vpop.f32.mrb[6].mxu0  ;;  %v2715_v27 = vpop.f32.mrb[6].mxu1  ;;  %v3618_v31 = vadd.s32 %v885_v12, %v665_v10  ;;  %v860_v47 = vadd.f32 %v3542_v25, %v3592_v63 }
  0xf3   : > { %vm652_vm13 = vcmp.gt.f32.partialorder %v2683_v13, %v636_v3  ;;  %v574_v17 = vpop.f32.mrb[7].mxu0  ;;  %vm872_vm15 = vcmp.gt.f32.partialorder %v2715_v27, %v856_v4  ;;  %v794_v33 = vpop.f32.mrb[7].mxu1  ;;  %v861_v3 = vadd.f32 %v3542_v25, %v3630_v42 }
  0xf4   : > { %v668_v32 = vsel %vm652_vm13, 1, %v3035_v7  ;;  %vm651_vm14 = vcmp.gt.f32.partialorder %v574_v17, %v635_v61  ;;  %v888_v36 = vsel %vm872_vm15, 1, %v3035_v7  ;;  %vm871_vm0 = vcmp.gt.f32.partialorder %v794_v33, %v855_v62  ;;  %v3659_v10 = vpop.permute.xlu0 %400 }
  0xf5   : > { %v667_v35 = vsel %vm651_vm14, 1, %v3035_v7  ;;  %v887_v37 = vsel %vm871_vm0, 1, %v3035_v7  ;;  %v3632_v43 = vadd.s32 %v888_v36, %v668_v32  ;;  %v864_v17 = vadd.f32 %v3542_v25, %v3648_v60  ;;  %v3682_v36 = vld [vmem:[%s4154_s1 + $0x3] ss:$0 sm:$0xff] }
  0xf6   : > { %v2686_v38 = vpop.f32.mrb[8].mxu0  ;;  %v2718_v45 = vpop.f32.mrb[8].mxu1  ;;  %v3638_v50 = vadd.s32 %v887_v37, %v667_v35  ;;  %v643_v32 = vadd.f32 %v3537_v24, %v3659_v10  ;;  %v863_v33 = vadd.f32 %v3542_v25, %v3659_v10  ;;  %v3677_v35 = vld [vmem:[%s4154_s1 + $0x2] ss:$0 sm:$0xff] }
  0xf7   : > { %vm654_vm1 = vcmp.gt.f32.partialorder %v2686_v38, %v638_v28  ;;  %v584_v44 = vpop.f32.mrb[9].mxu0  ;;  %vm874_vm3 = vcmp.gt.f32.partialorder %v2718_v45, %v858_v29  ;;  %v804_v52 = vpop.f32.mrb[9].mxu1  ;;  %v1069_v45 = vadd.f32 %v3677_v35, %v3524_v19 }
  0xf8   : > { %v670_v51 = vsel %vm654_vm1, 1, %v3035_v7  ;;  %vm653_vm2 = vcmp.gt.f32.partialorder %v584_v44, %v637_v14  ;;  %v890_v55 = vsel %vm874_vm3, 1, %v3035_v7  ;;  %vm873_vm4 = vcmp.gt.f32.partialorder %v804_v52, %v857_v15 }
  0xf9   : > { %v669_v53 = vsel %vm653_vm2, 1, %v3035_v7  ;;  %v889_v56 = vsel %vm873_vm4, 1, %v3035_v7  ;;  %v3650_v61 = vadd.s32 %v890_v55, %v670_v51  ;;  %v644_v15 = vadd.f32 %v3537_v24, %v3648_v60 }
  0xfa   : > { %v2689_v57 = vpop.f32.mrb[10].mxu0  ;;  %v2721_v1 = vpop.f32.mrb[10].mxu1  ;;  %v3656_v4 = vadd.s32 %v889_v56, %v669_v53  ;;  %v1070_v53 = vadd.f32 %v3677_v35, %v3528_v21  ;;  %v1290_v55 = vadd.f32 %v3682_v36, %v3528_v21 }
  0xfb   : > { %vm656_vm5 = vcmp.gt.f32.partialorder %v2689_v57, %v640_v46  ;;  %v594_v62 = vpop.f32.mrb[11].mxu0  ;;  %vm876_vm7 = vcmp.gt.f32.partialorder %v2721_v1, %v860_v47  ;;  %v814_v8 = vpop.f32.mrb[11].mxu1  ;;  %v1289_v46 = vadd.f32 %v3682_v36, %v3524_v19 }
  0xfc   : > { %v672_v6 = vsel %vm656_vm5, 1, %v3035_v7  ;;  %vm655_vm6 = vcmp.gt.f32.partialorder %v594_v62, %v639_v39  ;;  %v892_v12 = vsel %vm876_vm7, 1, %v3035_v7  ;;  %vm875_vm8 = vcmp.gt.f32.partialorder %v814_v8, %v859_v40 }
  0xfd   : > { %v671_v11 = vsel %vm655_vm6, 1, %v3035_v7  ;;  %v891_v13 = vsel %vm875_vm8, 1, %v3035_v7  ;;  %v3668_v27 = vadd.s32 %v892_v12, %v672_v6  ;;  %v1291_v6 = vadd.f32 %v3682_v36, %v3522_v18 }
  0xfe   : > { %v2692_v14 = vpop.f32.mrb[12].mxu0  ;;  %v2724_v29 = vpop.f32.mrb[12].mxu1  ;;  %v3684_v37 = vadd.s32 %v891_v13, %v671_v11  ;;  %v1072_v13 = vadd.f32 %v3677_v35, %v3526_v20 }
  0xff   : > { %vm658_vm9 = vcmp.gt.f32.partialorder %v2692_v14, %v642_v58  ;;  %v604_v28 = vpop.f32.mrb[13].mxu0  ;;  %vm878_vm11 = vcmp.gt.f32.partialorder %v2724_v29, %v862_v59  ;;  %v824_v24 = vpop.f32.mrb[13].mxu1  ;;  %v1292_v14 = vadd.f32 %v3682_v36, %v3526_v20 }
 0x100   : > { %v674_v38 = vsel %vm658_vm9, 1, %v3035_v7  ;;  %vm657_vm10 = vcmp.gt.f32.partialorder %v604_v28, %v641_v2  ;;  %v894_v25 = vsel %vm878_vm11, 1, %v3035_v7  ;;  %vm877_vm12 = vcmp.gt.f32.partialorder %v824_v24, %v861_v3 }
 0x101   : > { %v673_v39 = vsel %vm657_vm10, 1, %v3035_v7  ;;  %v893_v40 = vsel %vm877_vm12, 1, %v3035_v7  ;;  %v3694_v47 = vadd.s32 %v894_v25, %v674_v38  ;;  %v1071_v3 = vadd.f32 %v3677_v35, %v3522_v18 }
 0x102   : > { %v2695_v44 = vpop.f32.mrb[14].mxu0  ;;  %v2727_v52 = vpop.f32.mrb[14].mxu1  ;;  %v3700_v56 = vadd.s32 %v893_v40, %v673_v39  ;;  %v1073_v25 = vadd.f32 %v3677_v35, %v3532_v23  ;;  %v1293_v40 = vadd.f32 %v3682_v36, %v3532_v23 }
 0x103   : > { %vm660_vm13 = vcmp.gt.f32.partialorder %v2695_v44, %v644_v15  ;;  %v614_v51 = vpop.f32.mrb[15].mxu0  ;;  %vm880_vm15 = vcmp.gt.f32.partialorder %v2727_v52, %v864_v17  ;;  %v834_v58 = vpop.f32.mrb[15].mxu1 }
 0x104   : > { %v676_v57 = vsel %vm660_vm13, 1, %v3035_v7  ;;  %vm659_vm14 = vcmp.gt.f32.partialorder %v614_v51, %v643_v32  ;;  %v896_v62 = vsel %vm880_vm15, 1, %v3035_v7  ;;  %vm879_vm0 = vcmp.gt.f32.partialorder %v834_v58, %v863_v33 }
 0x105   : > { %v675_v59 = vsel %vm659_vm14, 1, %v3035_v7  ;;  %v895_v1 = vsel %vm879_vm0, 1, %v3035_v7  ;;  %v3710_v8 = vadd.s32 %v896_v62, %v676_v57  ;;  %v1074_v51 = vadd.f32 %v3677_v35, %v3530_v22 }
 0x106   : > { %v2738_v2 = vpop.f32.mrb[16].mxu0  ;;  %v2770_v12 = vpop.f32.mrb[16].mxu1  ;;  %v3716_v15 = vadd.s32 %v895_v1, %v675_v59 }
 0x107   : > { %vm1086_vm1 = vcmp.gt.f32.partialorder %v2738_v2, %v1070_v53  ;;  %v984_v11 = vpop.f32.mrb[17].mxu0  ;;  %vm1306_vm3 = vcmp.gt.f32.partialorder %v2770_v12, %v1290_v55  ;;  %v1204_v28 = vpop.f32.mrb[17].mxu1  ;;  %v1075_v2 = vadd.f32 %v3677_v35, %v3552_v30 }
 0x108   : > { %v1102_v17 = vsel %vm1086_vm1, 1, %v3035_v7  ;;  %vm1085_vm2 = vcmp.gt.f32.partialorder %v984_v11, %v1069_v45  ;;  %v1322_v33 = vsel %vm1306_vm3, 1, %v3035_v7  ;;  %vm1305_vm4 = vcmp.gt.f32.partialorder %v1204_v28, %v1289_v46 }
 0x109   : > { %v1118_v29 = vadd.s32 %v1102_v17, %v3576_v49  ;;  %v1101_v32 = vsel %vm1085_vm2, 1, %v3035_v7  ;;  %v1321_v24 = vsel %vm1305_vm4, 1, %v3035_v7 }
 0x10a   : > { %v1117_v38 = vadd.s32 %v1101_v32, %v3582_v54  ;;  %v2741_v39 = vpop.f32.mrb[18].mxu0  ;;  %v2773_v45 = vpop.f32.mrb[18].mxu1  ;;  %v1294_v54 = vadd.f32 %v3682_v36, %v3530_v22 }
 0x10b   : > { %v3728_v44 = vadd.s32 %v1322_v33, %v1118_v29  ;;  %vm1088_vm5 = vcmp.gt.f32.partialorder %v2741_v39, %v1072_v13  ;;  %v994_v49 = vpop.f32.mrb[19].mxu0  ;;  %vm1308_vm7 = vcmp.gt.f32.partialorder %v2773_v45, %v1292_v14  ;;  %v1214_v53 = vpop.f32.mrb[19].mxu1  ;;  %v1076_v13 = vadd.f32 %v3677_v35, %v3544_v26 }
 0x10c   : > { %v3734_v46 = vadd.s32 %v1321_v24, %v1117_v38  ;;  %v1104_v52 = vsel %vm1088_vm5, 1, %v3035_v7  ;;  %vm1087_vm6 = vcmp.gt.f32.partialorder %v994_v49, %v1071_v3  ;;  %v1324_v58 = vsel %vm1308_vm7, 1, %v3035_v7 }
 0x10d   : > { %v1120_v55 = vadd.s32 %v1104_v52, %v3594_v0  ;;  %v1103_v57 = vsel %vm1087_vm6, 1, %v3035_v7  ;;  %vm1307_vm8 = vcmp.gt.f32.partialorder %v1214_v53, %v1291_v6  ;;  %v1295_v3 = vadd.f32 %v3682_v36, %v3552_v30 }
 0x10e   : > { %v1119_v59 = vadd.s32 %v1103_v57, %v3600_v5  ;;  %v1323_v62 = vsel %vm1307_vm8, 1, %v3035_v7  ;;  %v2744_v1 = vpop.f32.mrb[20].mxu0  ;;  %v2776_v12 = vpop.f32.mrb[20].mxu1  ;;  %v1296_v5 = vadd.f32 %v3682_v36, %v3544_v26  ;;  %v1077_v39 = vadd.f32 %v3677_v35, %v3574_v48 }
 0x10f   : > { %v3746_v11 = vadd.s32 %v1324_v58, %v1120_v55  ;;  %vm1090_vm9 = vcmp.gt.f32.partialorder %v2744_v1, %v1074_v51  ;;  %v1004_v0 = vpop.f32.mrb[21].mxu0  ;;  %vm1310_vm11 = vcmp.gt.f32.partialorder %v2776_v12, %v1294_v54  ;;  %v1224_v17 = vpop.f32.mrb[21].mxu1  ;;  %v1078_v51 = vadd.f32 %v3677_v35, %v3565_v41 }
 0x110   : > { %v3752_v6 = vadd.s32 %v1323_v62, %v1119_v59  ;;  %v1106_v14 = vsel %vm1090_vm9, 1, %v3035_v7  ;;  %vm1089_vm10 = vcmp.gt.f32.partialorder %v1004_v0, %v1073_v25  ;;  %v1326_v32 = vsel %vm1310_vm11, 1, %v3035_v7 }
 0x111   : > { %v1122_v28 = vadd.s32 %v1106_v14, %v3612_v16  ;;  %v1105_v29 = vsel %vm1089_vm10, 1, %v3035_v7  ;;  %vm1309_vm12 = vcmp.gt.f32.partialorder %v1224_v17, %v1293_v40  ;;  %v1297_v25 = vadd.f32 %v3682_v36, %v3574_v48 }
 0x112   : > { %v1121_v33 = vadd.s32 %v1105_v29, %v3618_v31  ;;  %v1325_v38 = vsel %vm1309_vm12, 1, %v3035_v7  ;;  %v2747_v24 = vpop.f32.mrb[22].mxu0  ;;  %v2779_v45 = vpop.f32.mrb[22].mxu1  ;;  %v1298_v31 = vadd.f32 %v3682_v36, %v3565_v41  ;;  %v1079_v1 = vadd.f32 %v3677_v35, %v3603_v9 }
 0x113   : > { %v3764_v49 = vadd.s32 %v1326_v32, %v1122_v28  ;;  %vm1092_vm13 = vcmp.gt.f32.partialorder %v2747_v24, %v1076_v13  ;;  %v1014_v16 = vpop.f32.mrb[23].mxu0  ;;  %vm1312_vm15 = vcmp.gt.f32.partialorder %v2779_v45, %v1296_v5  ;;  %v1234_v52 = vpop.f32.mrb[23].mxu1  ;;  %v1080_v13 = vadd.f32 %v3677_v35, %v3592_v63 }
 0x114   : > { %v3770_v40 = vadd.s32 %v1325_v38, %v1121_v33  ;;  %v1108_v54 = vsel %vm1092_vm13, 1, %v3035_v7  ;;  %vm1091_vm14 = vcmp.gt.f32.partialorder %v1014_v16, %v1075_v2  ;;  %v1328_v57 = vsel %vm1312_vm15, 1, %v3035_v7 }
 0x115   : > { %v1124_v53 = vadd.s32 %v1108_v54, %v3632_v43  ;;  %v1107_v55 = vsel %vm1091_vm14, 1, %v3035_v7  ;;  %vm1311_vm0 = vcmp.gt.f32.partialorder %v1234_v52, %v1295_v3  ;;  %v1299_v2 = vadd.f32 %v3682_v36, %v3603_v9 }
 0x116   : > { %v1123_v58 = vadd.s32 %v1107_v55, %v3638_v50  ;;  %v1327_v59 = vsel %vm1311_vm0, 1, %v3035_v7  ;;  %v2750_v62 = vpop.f32.mrb[24].mxu0  ;;  %v2782_v12 = vpop.f32.mrb[24].mxu1  ;;  %v1300_v50 = vadd.f32 %v3682_v36, %v3592_v63  ;;  %v1082_v24 = vadd.f32 %v3677_v35, %v3621_v34 }
 0x117   : > { %v3782_v0 = vadd.s32 %v1328_v57, %v1124_v53  ;;  %vm1094_vm1 = vcmp.gt.f32.partialorder %v2750_v62, %v1078_v51  ;;  %v1024_v43 = vpop.f32.mrb[25].mxu0  ;;  %vm1314_vm3 = vcmp.gt.f32.partialorder %v2782_v12, %v1298_v31  ;;  %v1244_v14 = vpop.f32.mrb[25].mxu1  ;;  %v1081_v51 = vadd.f32 %v3677_v35, %v3630_v42 }
 0x118   : > { %v3788_v3 = vadd.s32 %v1327_v59, %v1123_v58  ;;  %v1110_v5 = vsel %vm1094_vm1, 1, %v3035_v7  ;;  %vm1093_vm2 = vcmp.gt.f32.partialorder %v1024_v43, %v1077_v39  ;;  %v1330_v29 = vsel %vm1314_vm3, 1, %v3035_v7 }
 0x119   : > { %v1126_v17 = vadd.s32 %v1110_v5, %v3650_v61  ;;  %v1109_v28 = vsel %vm1093_vm2, 1, %v3035_v7  ;;  %vm1313_vm4 = vcmp.gt.f32.partialorder %v1244_v14, %v1297_v25  ;;  %v1302_v39 = vadd.f32 %v3682_v36, %v3621_v34 }
 0x11a   : > { %v1125_v32 = vadd.s32 %v1109_v28, %v3656_v4  ;;  %v1329_v33 = vsel %vm1313_vm4, 1, %v3035_v7  ;;  %v2753_v38 = vpop.f32.mrb[26].mxu0  ;;  %v2785_v45 = vpop.f32.mrb[26].mxu1  ;;  %v1301_v4 = vadd.f32 %v3682_v36, %v3630_v42  ;;  %v1084_v62 = vadd.f32 %v3677_v35, %v3648_v60 }
 0x11b   : > { %v3800_v16 = vadd.s32 %v1330_v29, %v1126_v17  ;;  %vm1096_vm5 = vcmp.gt.f32.partialorder %v2753_v38, %v1080_v13  ;;  %v1034_v61 = vpop.f32.mrb[27].mxu0  ;;  %vm1316_vm7 = vcmp.gt.f32.partialorder %v2785_v45, %v1300_v50  ;;  %v1254_v54 = vpop.f32.mrb[27].mxu1  ;;  %v1083_v13 = vadd.f32 %v3677_v35, %v3659_v10  ;;  %v3835_v17 = vld [vmem:[%s4154_s1 + $0x5] ss:$0 sm:$0xff] }
 0x11c   : > { %v3806_v25 = vadd.s32 %v1329_v33, %v1125_v32  ;;  %v1112_v31 = vsel %vm1096_vm5, 1, %v3035_v7  ;;  %vm1095_vm6 = vcmp.gt.f32.partialorder %v1034_v61, %v1079_v1  ;;  %v1332_v55 = vsel %vm1316_vm7, 1, %v3035_v7 }
 0x11d   : > { %v1128_v52 = vadd.s32 %v1112_v31, %v3668_v27  ;;  %v1111_v53 = vsel %vm1095_vm6, 1, %v3035_v7  ;;  %vm1315_vm8 = vcmp.gt.f32.partialorder %v1254_v54, %v1299_v2  ;;  %v1304_v1 = vadd.f32 %v3682_v36, %v3648_v60  ;;  %v3827_v2 = vld [vmem:[%s4154_s1 + $0x4] ss:$0 sm:$0xff] }
 0x11e   : > { %v1127_v57 = vadd.s32 %v1111_v53, %v3684_v37  ;;  %v1331_v58 = vsel %vm1315_vm8, 1, %v3035_v7  ;;  %v2756_v59 = vpop.f32.mrb[28].mxu0  ;;  %v2788_v12 = vpop.f32.mrb[28].mxu1  ;;  %v1303_v37 = vadd.f32 %v3682_v36, %v3659_v10  ;;  %v1510_v38 = vadd.f32 %v3827_v2, %v3528_v21 }
 0x11f   : > { %v3818_v43 = vadd.s32 %v1332_v55, %v1128_v52  ;;  %vm1098_vm9 = vcmp.gt.f32.partialorder %v2756_v59, %v1082_v24  ;;  %v1044_v27 = vpop.f32.mrb[29].mxu0  ;;  %vm1318_vm11 = vcmp.gt.f32.partialorder %v2788_v12, %v1302_v39  ;;  %v1264_v14 = vpop.f32.mrb[29].mxu1  ;;  %v1509_v24 = vadd.f32 %v3827_v2, %v3524_v19 }
 0x120   : > { %v3829_v50 = vadd.s32 %v1331_v58, %v1127_v57  ;;  %v1114_v5 = vsel %vm1098_vm9, 1, %v3035_v7  ;;  %vm1097_vm10 = vcmp.gt.f32.partialorder %v1044_v27, %v1081_v51  ;;  %v1334_v28 = vsel %vm1318_vm11, 1, %v3035_v7 }
 0x121   : > { %v1130_v35 = vadd.s32 %v1114_v5, %v3694_v47  ;;  %v1113_v36 = vsel %vm1097_vm10, 1, %v3035_v7  ;;  %vm1317_vm12 = vcmp.gt.f32.partialorder %v1264_v14, %v1301_v4  ;;  %v1730_v45 = vadd.f32 %v3835_v17, %v3528_v21 }
 0x122   : > { %v1129_v29 = vadd.s32 %v1113_v36, %v3700_v56  ;;  %v1333_v32 = vsel %vm1317_vm12, 1, %v3035_v7  ;;  %v2759_v33 = vpop.f32.mrb[30].mxu0  ;;  %v2791_v61 = vpop.f32.mrb[30].mxu1  ;;  %v1729_v56 = vadd.f32 %v3835_v17, %v3524_v19  ;;  %v1512_v59 = vadd.f32 %v3827_v2, %v3526_v20 }
 0x123   : > { %v3846_v39 = vadd.s32 %v1334_v28, %v1130_v35  ;;  %vm1100_vm13 = vcmp.gt.f32.partialorder %v2759_v33, %v1084_v62  ;;  %v1054_v47 = vpop.f32.mrb[31].mxu0  ;;  %vm1320_vm15 = vcmp.gt.f32.partialorder %v2791_v61, %v1304_v1  ;;  %v1274_v31 = vpop.f32.mrb[31].mxu1  ;;  %v1511_v62 = vadd.f32 %v3827_v2, %v3522_v18 }
 0x124   : > { %v3852_v51 = vadd.s32 %v1333_v32, %v1129_v29  ;;  %v1116_v4 = vsel %vm1100_vm13, 1, %v3035_v7  ;;  %vm1099_vm14 = vcmp.gt.f32.partialorder %v1054_v47, %v1083_v13  ;;  %v1336_v53 = vsel %vm1320_vm15, 1, %v3035_v7 }
 0x125   : > { %v1132_v54 = vadd.s32 %v1116_v4, %v3710_v8  ;;  %v1115_v52 = vsel %vm1099_vm14, 1, %v3035_v7  ;;  %vm1319_vm0 = vcmp.gt.f32.partialorder %v1274_v31, %v1303_v37  ;;  %v1732_v12 = vadd.f32 %v3835_v17, %v3526_v20 }
 0x126   : > { %v1131_v55 = vadd.s32 %v1115_v52, %v3716_v15  ;;  %v1335_v57 = vsel %vm1319_vm0, 1, %v3035_v7  ;;  %v2802_v58 = vpop.f32.mrb[32].mxu0  ;;  %v2834_v27 = vpop.f32.mrb[32].mxu1  ;;  %v1731_v15 = vadd.f32 %v3835_v17, %v3522_v18  ;;  %v1514_v33 = vadd.f32 %v3827_v2, %v3530_v22 }
 0x127   : > { %v3864_v1 = vadd.s32 %v1336_v53, %v1132_v54  ;;  %vm1526_vm1 = vcmp.gt.f32.partialorder %v2802_v58, %v1510_v38  ;;  %v1424_v8 = vpop.f32.mrb[33].mxu0  ;;  %vm1746_vm3 = vcmp.gt.f32.partialorder %v2834_v27, %v1730_v45  ;;  %v1644_v5 = vpop.f32.mrb[33].mxu1  ;;  %v1513_v38 = vadd.f32 %v3827_v2, %v3532_v23 }
 0x128   : > { %v3870_v13 = vadd.s32 %v1335_v57, %v1131_v55  ;;  %v1542_v37 = vsel %vm1526_vm1, 1, %v3035_v7  ;;  %vm1525_vm2 = vcmp.gt.f32.partialorder %v1424_v8, %v1509_v24  ;;  %v1762_v36 = vsel %vm1746_vm3, 1, %v3035_v7 }
 0x129   : > { %v1558_v14 = vadd.s32 %v1542_v37, %v3728_v44  ;;  %v1541_v35 = vsel %vm1525_vm2, 1, %v3035_v7  ;;  %vm1745_vm4 = vcmp.gt.f32.partialorder %v1644_v5, %v1729_v56  ;;  %v1734_v61 = vadd.f32 %v3835_v17, %v3530_v22 }
 0x12a   : > { %v1557_v28 = vadd.s32 %v1541_v35, %v3734_v46  ;;  %v1761_v29 = vsel %vm1745_vm4, 1, %v3035_v7  ;;  %v2805_v32 = vpop.f32.mrb[34].mxu0  ;;  %v2837_v47 = vpop.f32.mrb[34].mxu1  ;;  %v1733_v46 = vadd.f32 %v3835_v17, %v3532_v23  ;;  %v1516_v58 = vadd.f32 %v3827_v2, %v3544_v26 }
 0x12b   : > { %v3882_v24 = vadd.s32 %v1762_v36, %v1558_v14  ;;  %vm1528_vm5 = vcmp.gt.f32.partialorder %v2805_v32, %v1512_v59  ;;  %v1434_v44 = vpop.f32.mrb[35].mxu0  ;;  %vm1748_vm7 = vcmp.gt.f32.partialorder %v2837_v47, %v1732_v12  ;;  %v1654_v4 = vpop.f32.mrb[35].mxu1  ;;  %v1515_v59 = vadd.f32 %v3827_v2, %v3552_v30 }
 0x12c   : > { %v3888_v45 = vadd.s32 %v1761_v29, %v1557_v28  ;;  %v1544_v56 = vsel %vm1528_vm5, 1, %v3035_v7  ;;  %vm1527_vm6 = vcmp.gt.f32.partialorder %v1434_v44, %v1511_v62  ;;  %v1764_v52 = vsel %vm1748_vm7, 1, %v3035_v7 }
 0x12d   : > { %v1560_v31 = vadd.s32 %v1544_v56, %v3746_v11  ;;  %v1543_v54 = vsel %vm1527_vm6, 1, %v3035_v7  ;;  %vm1747_vm8 = vcmp.gt.f32.partialorder %v1654_v4, %v1731_v15  ;;  %v1736_v27 = vadd.f32 %v3835_v17, %v3544_v26 }
 0x12e   : > { %v1559_v53 = vadd.s32 %v1543_v54, %v3752_v6  ;;  %v1763_v55 = vsel %vm1747_vm8, 1, %v3035_v7  ;;  %v2808_v57 = vpop.f32.mrb[36].mxu0  ;;  %v2840_v8 = vpop.f32.mrb[36].mxu1  ;;  %v1735_v6 = vadd.f32 %v3835_v17, %v3552_v30  ;;  %v1518_v32 = vadd.f32 %v3827_v2, %v3565_v41 }
 0x12f   : > { %v3900_v62 = vadd.s32 %v1764_v52, %v1560_v31  ;;  %vm1530_vm9 = vcmp.gt.f32.partialorder %v2808_v57, %v1514_v33  ;;  %v1444_v11 = vpop.f32.mrb[37].mxu0  ;;  %vm1750_vm11 = vcmp.gt.f32.partialorder %v2840_v8, %v1734_v61  ;;  %v1664_v37 = vpop.f32.mrb[37].mxu1  ;;  %v1517_v33 = vadd.f32 %v3827_v2, %v3574_v48 }
 0x130   : > { %v3906_v12 = vadd.s32 %v1763_v55, %v1559_v53  ;;  %v1546_v15 = vsel %vm1530_vm9, 1, %v3035_v7  ;;  %vm1529_vm10 = vcmp.gt.f32.partialorder %v1444_v11, %v1513_v38  ;;  %v1766_v35 = vsel %vm1750_vm11, 1, %v3035_v7 }
 0x131   : > { %v1562_v5 = vadd.s32 %v1546_v15, %v3764_v49  ;;  %v1545_v14 = vsel %vm1529_vm10, 1, %v3035_v7  ;;  %vm1749_vm12 = vcmp.gt.f32.partialorder %v1664_v37, %v1733_v46  ;;  %v1738_v47 = vadd.f32 %v3835_v17, %v3565_v41 }
 0x132   : > { %v1561_v36 = vadd.s32 %v1545_v14, %v3770_v40  ;;  %v1765_v28 = vsel %vm1749_vm12, 1, %v3035_v7  ;;  %v2811_v29 = vpop.f32.mrb[38].mxu0  ;;  %v2843_v44 = vpop.f32.mrb[38].mxu1  ;;  %v1737_v40 = vadd.f32 %v3835_v17, %v3574_v48  ;;  %v1520_v57 = vadd.f32 %v3827_v2, %v3592_v63 }
 0x133   : > { %v3918_v38 = vadd.s32 %v1766_v35, %v1562_v5  ;;  %vm1532_vm13 = vcmp.gt.f32.partialorder %v2811_v29, %v1516_v58  ;;  %v1454_v49 = vpop.f32.mrb[39].mxu0  ;;  %vm1752_vm15 = vcmp.gt.f32.partialorder %v2843_v44, %v1736_v27  ;;  %v1674_v56 = vpop.f32.mrb[39].mxu1  ;;  %v1519_v58 = vadd.f32 %v3827_v2, %v3603_v9 }
 0x134   : > { %v3924_v61 = vadd.s32 %v1765_v28, %v1561_v36  ;;  %v1548_v46 = vsel %vm1532_vm13, 1, %v3035_v7  ;;  %vm1531_vm14 = vcmp.gt.f32.partialorder %v1454_v49, %v1515_v59  ;;  %v1768_v54 = vsel %vm1752_vm15, 1, %v3035_v7 }
 0x135   : > { %v1564_v4 = vadd.s32 %v1548_v46, %v3782_v0  ;;  %v1547_v31 = vsel %vm1531_vm14, 1, %v3035_v7  ;;  %vm1751_vm0 = vcmp.gt.f32.partialorder %v1674_v56, %v1735_v6  ;;  %v1740_v8 = vadd.f32 %v3835_v17, %v3592_v63 }
 0x136   : > { %v1563_v52 = vadd.s32 %v1547_v31, %v3788_v3  ;;  %v1767_v53 = vsel %vm1751_vm0, 1, %v3035_v7  ;;  %v2814_v55 = vpop.f32.mrb[40].mxu0  ;;  %v2846_v11 = vpop.f32.mrb[40].mxu1  ;;  %v1739_v3 = vadd.f32 %v3835_v17, %v3603_v9  ;;  %v1742_v31 = vadd.f32 %v3835_v17, %v3621_v34 }
 0x137   : > { %v3936_v59 = vadd.s32 %v1768_v54, %v1564_v4  ;;  %vm1534_vm1 = vcmp.gt.f32.partialorder %v2814_v55, %v1518_v32  ;;  %v1464_v0 = vpop.f32.mrb[41].mxu0  ;;  %vm1754_vm3 = vcmp.gt.f32.partialorder %v2846_v11, %v1738_v47  ;;  %v1684_v15 = vpop.f32.mrb[41].mxu1  ;;  %v1521_v54 = vadd.f32 %v3827_v2, %v3630_v42 }
 0x138   : > { %v3942_v27 = vadd.s32 %v1767_v53, %v1563_v52  ;;  %v1550_v6 = vsel %vm1534_vm1, 1, %v3035_v7  ;;  %vm1533_vm2 = vcmp.gt.f32.partialorder %v1464_v0, %v1517_v33  ;;  %v1770_v14 = vsel %vm1754_vm3, 1, %v3035_v7 }
 0x139   : > { %v1566_v37 = vadd.s32 %v1550_v6, %v3800_v16  ;;  %v1549_v5 = vsel %vm1533_vm2, 1, %v3035_v7  ;;  %vm1753_vm4 = vcmp.gt.f32.partialorder %v1684_v15, %v1737_v40  ;;  %v1522_v33 = vadd.f32 %v3827_v2, %v3621_v34 }
 0x13a   : > { %v1565_v35 = vadd.s32 %v1549_v5, %v3806_v25  ;;  %v1769_v36 = vsel %vm1753_vm4, 1, %v3035_v7  ;;  %v2817_v28 = vpop.f32.mrb[42].mxu0  ;;  %v2849_v49 = vpop.f32.mrb[42].mxu1  ;;  %v1744_v5 = vadd.f32 %v3835_v17, %v3648_v60 }
 0x13b   : > { %v3950_v29 = vadd.s32 %v1770_v14, %v1566_v37  ;;  %vm1536_vm5 = vcmp.gt.f32.partialorder %v2817_v28, %v1520_v57  ;;  %v1474_v32 = vpop.f32.mrb[43].mxu0  ;;  %vm1756_vm7 = vcmp.gt.f32.partialorder %v2849_v49, %v1740_v8  ;;  %v1694_v47 = vpop.f32.mrb[43].mxu1  ;;  %v1741_v57 = vadd.f32 %v3835_v17, %v3630_v42  ;;  %v3996_v49 = vld [vmem:[%s4154_s1 + $0x7] ss:$0 sm:$0xff] }
 0x13c   : > { %v3954_v44 = vadd.s32 %v1769_v36, %v1565_v35  ;;  %v1552_v16 = vsel %vm1536_vm5, 1, %v3035_v7  ;;  %vm1535_vm6 = vcmp.gt.f32.partialorder %v1474_v32, %v1519_v58  ;;  %v1772_v46 = vsel %vm1756_vm7, 1, %v3035_v7 }
 0x13d   : > { %v1568_v25 = vadd.s32 %v1552_v16, %v3818_v43  ;;  %v1551_v40 = vsel %vm1535_vm6, 1, %v3035_v7  ;;  %vm1755_vm8 = vcmp.gt.f32.partialorder %v1694_v47, %v1739_v3  ;;  %v1524_v3 = vadd.f32 %v3827_v2, %v3648_v60 }
 0x13e   : > { %v1567_v56 = vadd.s32 %v1551_v40, %v3829_v50  ;;  %v2820_v4 = vpop.f32.mrb[44].mxu0  ;;  %v1771_v53 = vsel %vm1755_vm8, 1, %v3035_v7  ;;  %v2852_v43 = vpop.f32.mrb[44].mxu1  ;;  %v1523_v14 = vadd.f32 %v3827_v2, %v3659_v10 }
 0x13f   : > { %v3965_v52 = vadd.s32 %v1772_v46, %v1568_v25  ;;  %vm1538_vm9 = vcmp.gt.f32.partialorder %v2820_v4, %v1522_v33  ;;  %v1484_v55 = vpop.f32.mrb[45].mxu0  ;;  %vm1758_vm10 = vcmp.gt.f32.partialorder %v2852_v43, %v1742_v31  ;;  %v1704_v0 = vpop.f32.mrb[45].mxu1  ;;  %v2170_v4 = vadd.f32 %v3996_v49, %v3528_v21 }
 0x140   : > { %v3970_v58 = vadd.s32 %v1771_v53, %v1567_v56  ;;  %v1554_v50 = vsel %vm1538_vm9, 1, %v3035_v7  ;;  %vm1537_vm11 = vcmp.gt.f32.partialorder %v1484_v55, %v1521_v54  ;;  %vm1757_vm12 = vcmp.gt.f32.partialorder %v1704_v0, %v1741_v57 }
 0x141   : > { %v1570_v11 = vadd.s32 %v1554_v50, %v3846_v39  ;;  %v1553_v8 = vsel %vm1537_vm11, 1, %v3035_v7  ;;  %v1774_v6 = vsel %vm1758_vm10, 1, %v3035_v7  ;;  %v3986_v39 = vld [vmem:[%s4154_s1 + $0x6] ss:$0 sm:$0xff]  ;;  %v1773_v36 = vsel %vm1757_vm12, 1, %v3035_v7 }
 0x142   : > { %v1569_v15 = vadd.s32 %v1553_v8, %v3852_v51  ;;  %v2823_v37 = vpop.f32.mrb[46].mxu0  ;;  %v2855_v28 = vpop.f32.mrb[46].mxu1  ;;  %v1743_v51 = vadd.f32 %v3835_v17, %v3659_v10  ;;  %v1950_v17 = vadd.f32 %v3986_v39, %v3528_v21  ;;  %v1949_v31 = vadd.f32 %v3986_v39, %v3524_v19 }
 0x143   : > { %v3988_v35 = vadd.s32 %v1774_v6, %v1570_v11  ;;  %vm1540_vm13 = vcmp.gt.f32.partialorder %v2823_v37, %v1524_v3  ;;  %v1494_v32 = vpop.f32.mrb[47].mxu0  ;;  %vm1760_vm14 = vcmp.gt.f32.partialorder %v2855_v28, %v1744_v5  ;;  %v1714_v16 = vpop.f32.mrb[47].mxu1  ;;  %v2169_v55 = vadd.f32 %v3996_v49, %v3524_v19 }
 0x144   : > { %v3998_v2 = vadd.s32 %v1773_v36, %v1569_v15  ;;  %v1556_v33 = vsel %vm1540_vm13, 1, %v3035_v7  ;;  %vm1539_vm15 = vcmp.gt.f32.partialorder %v1494_v32, %v1523_v14  ;;  %vm1759_vm0 = vcmp.gt.f32.partialorder %v1714_v16, %v1743_v51 }
 0x145   : > { %v1572_v47 = vadd.s32 %v1556_v33, %v3864_v1  ;;  %v1555_v25 = vsel %vm1539_vm15, 1, %v3035_v7  ;;  %v1776_v40 = vsel %vm1760_vm14, 1, %v3035_v7  ;;  %v1775_v1 = vsel %vm1759_vm0, 1, %v3035_v7 }
 0x146   : > { %v1571_v46 = vadd.s32 %v1555_v25, %v3870_v13  ;;  %v2866_v56 = vpop.f32.mrb[48].mxu0  ;;  %v2898_v53 = vpop.f32.mrb[48].mxu1  ;;  %v1952_v11 = vadd.f32 %v3986_v39, %v3526_v20  ;;  %v1951_v6 = vadd.f32 %v3986_v39, %v3522_v18  ;;  %v2171_v36 = vadd.f32 %v3996_v49, %v3522_v18 }
 0x147   : > { %v4011_v54 = vadd.s32 %v1776_v40, %v1572_v47  ;;  %vm1966_vm1 = vcmp.gt.f32.partialorder %v2866_v56, %v1950_v17  ;;  %v1864_v43 = vpop.f32.mrb[49].mxu0  ;;  %vm2186_vm2 = vcmp.gt.f32.partialorder %v2898_v53, %v2170_v4  ;;  %v2084_v21 = vpop.f32.mrb[49].mxu1  ;;  %v1954_v33 = vadd.f32 %v3986_v39, %v3530_v22 }
 0x148   : > { %v4016_v57 = vadd.s32 %v1775_v1, %v1571_v46  ;;  %v1982_v13 = vsel %vm1966_vm1, 1, %v3035_v7  ;;  %vm1965_vm3 = vcmp.gt.f32.partialorder %v1864_v43, %v1949_v31  ;;  %vm2185_vm4 = vcmp.gt.f32.partialorder %v2084_v21, %v2169_v55 }
 0x149   : > { %v1998_v50 = vadd.s32 %v1982_v13, %v3882_v24  ;;  %v1981_v0 = vsel %vm1965_vm3, 1, %v3035_v7  ;;  %v2202_v19 = vsel %vm2186_vm2, 1, %v3035_v7  ;;  %v2172_v24 = vadd.f32 %v3996_v49, %v3526_v20 }
 0x14a   : > { %v1997_v8 = vadd.s32 %v1981_v0, %v3888_v45  ;;  %v2869_v3 = vpop.f32.mrb[50].mxu0  ;;  %v2201_v37 = vsel %vm2185_vm4, 1, %v3035_v7  ;;  %v2901_v5 = vpop.f32.mrb[50].mxu1  ;;  %v2174_v25 = vadd.f32 %v3996_v49, %v3530_v22  ;;  %v1953_v17 = vadd.f32 %v3986_v39, %v3532_v23 }
 0x14b   : > { %v2218_v15 = vadd.s32 %v2202_v19, %v1998_v50  ;;  %vm1968_vm5 = vcmp.gt.f32.partialorder %v2869_v3, %v1952_v11  ;;  %v1874_v14 = vpop.f32.mrb[51].mxu0  ;;  %vm2188_vm6 = vcmp.gt.f32.partialorder %v2901_v5, %v2172_v24  ;;  %v2094_v32 = vpop.f32.mrb[51].mxu1  ;;  %v2173_v4 = vadd.f32 %v3996_v49, %v3532_v23 }
 0x14c   : > { %v2217_v28 = vadd.s32 %v2201_v37, %v1997_v8  ;;  %v1984_v45 = vsel %vm1968_vm5, 1, %v3035_v7  ;;  %vm1967_vm7 = vcmp.gt.f32.partialorder %v1874_v14, %v1951_v6  ;;  %vm2187_vm8 = vcmp.gt.f32.partialorder %v2094_v32, %v2171_v36 }
 0x14d   : > { %2234 = vst [vmem:[%s4027_s19 + $0x8] sm:$0xff] %v2218_v15  ;;  %v2000_v20 = vadd.s32 %v1984_v45, %v3900_v62  ;;  %v1983_v51 = vsel %vm1967_vm7, 1, %v3035_v7  ;;  %v2204_v16 = vsel %vm2188_vm6, 1, %v3035_v7  ;;  %v2203_v40 = vsel %vm2187_vm8, 1, %v3035_v7 }
 0x14e   : > { %2233 = vst [vmem:[%s4027_s19] sm:$0xff] %v2217_v28  ;;  %v1999_v18 = vadd.s32 %v1983_v51, %v3906_v12  ;;  %v2872_v47 = vpop.f32.mrb[52].mxu0  ;;  %v2904_v46 = vpop.f32.mrb[52].mxu1  ;;  %v1956_v43 = vadd.f32 %v3986_v39, %v3544_v26  ;;  %v2176_v21 = vadd.f32 %v3996_v49, %v3544_v26  ;;  %v1955_v50 = vadd.f32 %v3986_v39, %v3552_v30 }
 0x14f   : > { %v2220_v62 = vadd.s32 %v2204_v16, %v2000_v20  ;;  %vm1970_vm9 = vcmp.gt.f32.partialorder %v2872_v47, %v1954_v33  ;;  %v1884_v56 = vpop.f32.mrb[53].mxu0  ;;  %vm2190_vm10 = vcmp.gt.f32.partialorder %v2904_v46, %v2174_v25  ;;  %v2104_v1 = vpop.f32.mrb[53].mxu1  ;;  %v2175_v8 = vadd.f32 %v3996_v49, %v3552_v30 }
 0x150   : > { %v2219_v31 = vadd.s32 %v2203_v40, %v1999_v18  ;;  %v1986_v12 = vsel %vm1970_vm9, 1, %v3035_v7  ;;  %vm1969_vm11 = vcmp.gt.f32.partialorder %v1884_v56, %v1953_v17  ;;  %vm2189_vm12 = vcmp.gt.f32.partialorder %v2104_v1, %v2173_v4 }
 0x151   : > { %2236 = vst [vmem:[%s4027_s19 + $0x18] sm:$0xff] %v2220_v62  ;;  %v2002_v22 = vadd.s32 %v1986_v12, %v3918_v38  ;;  %v1985_v53 = vsel %vm1969_vm11, 1, %v3035_v7  ;;  %v2206_v55 = vsel %vm2190_vm10, 1, %v3035_v7  ;;  %v2205_v0 = vsel %vm2189_vm12, 1, %v3035_v7 }
 0x152   : > { %2235 = vst [vmem:[%s4027_s19 + $0x10] sm:$0xff] %v2219_v31  ;;  %v2001_v23 = vadd.s32 %v1985_v53, %v3924_v61  ;;  %v2875_v13 = vpop.f32.mrb[54].mxu0  ;;  %v2907_v11 = vpop.f32.mrb[54].mxu1  ;;  %v1958_v15 = vadd.f32 %v3986_v39, %v3565_v41  ;;  %v2178_v14 = vadd.f32 %v3996_v49, %v3565_v41  ;;  %v1957_v36 = vadd.f32 %v3986_v39, %v3574_v48 }
 0x153   : > { %v2222_v38 = vadd.s32 %v2206_v55, %v2002_v22  ;;  %vm1972_vm13 = vcmp.gt.f32.partialorder %v2875_v13, %v1956_v43  ;;  %v1894_v19 = vpop.f32.mrb[55].mxu0  ;;  %vm2192_vm14 = vcmp.gt.f32.partialorder %v2907_v11, %v2176_v21  ;;  %v2114_v24 = vpop.f32.mrb[55].mxu1  ;;  %v2177_v20 = vadd.f32 %v3996_v49, %v3574_v48 }
 0x154   : > { %v2221_v3 = vadd.s32 %v2205_v0, %v2001_v23  ;;  %v1988_v61 = vsel %vm1972_vm13, 1, %v3035_v7  ;;  %vm1971_vm15 = vcmp.gt.f32.partialorder %v1894_v19, %v1955_v50  ;;  %vm2191_vm0 = vcmp.gt.f32.partialorder %v2114_v24, %v2175_v8 }
 0x155   : > { %2238 = vst [vmem:[%s4027_s19 + $0x28] sm:$0xff] %v2222_v38  ;;  %v2004_v26 = vadd.s32 %v1988_v61, %v3936_v59  ;;  %v1987_v6 = vsel %vm1971_vm15, 1, %v3035_v7  ;;  %v2208_v37 = vsel %vm2192_vm14, 1, %v3035_v7  ;;  %v2207_v28 = vsel %vm2191_vm0, 1, %v3035_v7 }
 0x156   : > { %2237 = vst [vmem:[%s4027_s19 + $0x20] sm:$0xff] %v2221_v3  ;;  %v2003_v30 = vadd.s32 %v1987_v6, %v3942_v27  ;;  %v2878_v5 = vpop.f32.mrb[56].mxu0  ;;  %v2910_v45 = vpop.f32.mrb[56].mxu1  ;;  %v1960_v18 = vadd.f32 %v3986_v39, %v3592_v63  ;;  %v2180_v17 = vadd.f32 %v3996_v49, %v3592_v63  ;;  %v1959_v62 = vadd.f32 %v3986_v39, %v3603_v9 }
 0x157   : > { %v2224_v59 = vadd.s32 %v2208_v37, %v2004_v26  ;;  %vm1974_vm1 = vcmp.gt.f32.partialorder %v2878_v5, %v1958_v15  ;;  %v1904_v32 = vpop.f32.mrb[57].mxu0  ;;  %vm2194_vm2 = vcmp.gt.f32.partialorder %v2910_v45, %v2178_v14  ;;  %v2124_v33 = vpop.f32.mrb[57].mxu1  ;;  %v2179_v4 = vadd.f32 %v3996_v49, %v3603_v9 }
 0x158   : > { %v2223_v51 = vadd.s32 %v2207_v28, %v2003_v30  ;;  %v1990_v27 = vsel %vm1974_vm1, 1, %v3035_v7  ;;  %vm1973_vm3 = vcmp.gt.f32.partialorder %v1904_v32, %v1957_v36  ;;  %vm2193_vm4 = vcmp.gt.f32.partialorder %v2124_v33, %v2177_v20 }
 0x159   : > { %2240 = vst [vmem:[%s4027_s19 + $0x38] sm:$0xff] %v2224_v59  ;;  %v2006_v41 = vadd.s32 %v1990_v27, %v3950_v29  ;;  %v1989_v16 = vsel %vm1973_vm3, 1, %v3035_v7  ;;  %v2210_v47 = vsel %vm2194_vm2, 1, %v3035_v7  ;;  %v2209_v40 = vsel %vm2193_vm4, 1, %v3035_v7 }
 0x15a   : > { %2239 = vst [vmem:[%s4027_s19 + $0x30] sm:$0xff] %v2223_v51  ;;  %v2005_v48 = vadd.s32 %v1989_v16, %v3954_v44  ;;  %v2881_v25 = vpop.f32.mrb[58].mxu0  ;;  %v2913_v46 = vpop.f32.mrb[58].mxu1  ;;  %v1962_v22 = vadd.f32 %v3986_v39, %v3621_v34  ;;  %v2182_v55 = vadd.f32 %v3996_v49, %v3621_v34  ;;  %v1961_v23 = vadd.f32 %v3986_v39, %v3630_v42 }
 0x15b   : > { %v2226_v29 = vadd.s32 %v2210_v47, %v2006_v41  ;;  %vm1976_vm5 = vcmp.gt.f32.partialorder %v2881_v25, %v1960_v18  ;;  %v1914_v56 = vpop.f32.mrb[59].mxu0  ;;  %vm2196_vm6 = vcmp.gt.f32.partialorder %v2913_v46, %v2180_v17  ;;  %v2134_v12 = vpop.f32.mrb[59].mxu1  ;;  %v2181_v38 = vadd.f32 %v3996_v49, %v3630_v42 }
 0x15c   : > { %v2225_v31 = vadd.s32 %v2209_v40, %v2005_v48  ;;  %v1992_v44 = vsel %vm1976_vm5, 1, %v3035_v7  ;;  %vm1975_vm7 = vcmp.gt.f32.partialorder %v1914_v56, %v1959_v62  ;;  %vm2195_vm8 = vcmp.gt.f32.partialorder %v2134_v12, %v2179_v4 }
 0x15d   : > { %2242 = vst [vmem:[%s4027_s19 + $0x48] sm:$0xff] %v2226_v29  ;;  %v2008_v63 = vadd.s32 %v1992_v44, %v3965_v52  ;;  %v1991_v1 = vsel %vm1975_vm7, 1, %v3035_v7  ;;  %v2212_v53 = vsel %vm2196_vm6, 1, %v3035_v7  ;;  %v2211_v13 = vsel %vm2195_vm8, 1, %v3035_v7 }
 0x15e   : > { %2241 = vst [vmem:[%s4027_s19 + $0x40] sm:$0xff] %v2225_v31  ;;  %v2007_v9 = vadd.s32 %v1991_v1, %v3970_v58  ;;  %v2884_v43 = vpop.f32.mrb[60].mxu0  ;;  %v2916_v21 = vpop.f32.mrb[60].mxu1  ;;  %v1964_v8 = vadd.f32 %v3986_v39, %v3648_v60  ;;  %v2184_v24 = vadd.f32 %v3996_v49, %v3648_v60  ;;  %v1963_v26 = vadd.f32 %v3986_v39, %v3659_v10 }
 0x15f   : > { %v2228_v52 = vadd.s32 %v2212_v53, %v2008_v63  ;;  %vm1978_vm9 = vcmp.gt.f32.partialorder %v2884_v43, %v1962_v22  ;;  %v1924_v50 = vpop.f32.mrb[61].mxu0  ;;  %vm2198_vm10 = vcmp.gt.f32.partialorder %v2916_v21, %v2182_v55  ;;  %v2144_v11 = vpop.f32.mrb[61].mxu1  ;;  %v2183_v30 = vadd.f32 %v3996_v49, %v3659_v10 }
 0x160   : > { %v2227_v0 = vadd.s32 %v2211_v13, %v2007_v9  ;;  %v1994_v58 = vsel %vm1978_vm9, 1, %v3035_v7  ;;  %vm1977_vm11 = vcmp.gt.f32.partialorder %v1924_v50, %v1961_v23  ;;  %vm2197_vm12 = vcmp.gt.f32.partialorder %v2144_v11, %v2181_v38 }
 0x161   : > { %2244 = vst [vmem:[%s4027_s19 + $0x58] sm:$0xff] %v2228_v52  ;;  %v2010_v34 = vadd.s32 %v1994_v58, %v3988_v35  ;;  %v1993_v19 = vsel %vm1977_vm11, 1, %v3035_v7  ;;  %v2214_v3 = vsel %vm2198_vm10, 1, %v3035_v7  ;;  %v2213_v6 = vsel %vm2197_vm12, 1, %v3035_v7 }
 0x162   : > { %2243 = vst [vmem:[%s4027_s19 + $0x50] sm:$0xff] %v2227_v0  ;;  %v2009_v42 = vadd.s32 %v1993_v19, %v3998_v2  ;;  %v2887_v61 = vpop.f32.mrb[62].mxu0  ;;  %v2919_v15 = vpop.f32.mrb[62].mxu1 }
 0x163   : > { %v2230_v35 = vadd.s32 %v2214_v3, %v2010_v34  ;;  %vm1980_vm13 = vcmp.gt.f32.partialorder %v2887_v61, %v1964_v8  ;;  %v1934_v37 = vpop.f32.mrb[63].mxu0  ;;  %vm2200_vm14 = vcmp.gt.f32.partialorder %v2919_v15, %v2184_v24  ;;  %v2154_v60 = vpop.f32.mrb[63].mxu1 }
 0x164   : > { %v2229_v5 = vadd.s32 %v2213_v6, %v2009_v42  ;;  %v1996_v2 = vsel %vm1980_vm13, 1, %v3035_v7  ;;  %vm1979_vm15 = vcmp.gt.f32.partialorder %v1934_v37, %v1963_v26  ;;  %vm2199_vm0 = vcmp.gt.f32.partialorder %v2154_v60, %v2183_v30 }
 0x165   : > { %2246 = vst [vmem:[%s4027_s19 + $0x68] sm:$0xff] %v2230_v35  ;;  %v2012_v39 = vadd.s32 %v1996_v2, %v4011_v54  ;;  %v1995_v14 = vsel %vm1979_vm15, 1, %v3035_v7  ;;  %v2216_v36 = vsel %vm2200_vm14, 1, %v3035_v7  ;;  %v2215_v49 = vsel %vm2199_vm0, 1, %v3035_v7 }
 0x166   : > { %2245 = vst [vmem:[%s4027_s19 + $0x60] sm:$0xff] %v2229_v5  ;;  %v2011_v59 = vadd.s32 %v1995_v14, %v4016_v57 }
 0x167   : > { %v2232_v10 = vadd.s32 %v2216_v36, %v2012_v39 }
 0x168   : > { %v2231_v28 = vadd.s32 %v2215_v49, %v2011_v59 }
 0x169   : > { %2248 = vst [vmem:[%s4027_s19 + $0x78] sm:$0xff] %v2232_v10 }
 0x16a   : > { %2247 = vst [vmem:[%s4027_s19 + $0x70] sm:$0xff] %v2231_v28 }
 0x16b PF: > { %s14_s17 = sadd.s32 1, %s3033_s17   ;;  %s4158_s15 = smov %s3029_s16 }
 0x16c   : > { %p11_p5 = scmp.ge.s32.totalorder %s14_s17, 4   ;;  %s4159_s16 = smov %s4161_s18 }
 0x16e   :  { %13 = sbr.rel (!%p11_p5) target bundleno = 2 (0x2), region = 79 }

</bundles_post_ra>
